<compile_context>
chip_gen: v7x
topology: tpu7x:2x2x1
jax: 0.10.0
libtpu: 0.0.40
codegen_flags: <defaults>
</compile_context>

<pallas_src>
import math
import functools

import jax
import jax.numpy as jnp
from jax import lax
from jax.experimental import pallas as pl
from jax.experimental.pallas import tpu as pltpu


def _attn_kernel(*refs, scale, head_num, causal, has_mask):
    if has_mask:
        q_ref, k_ref, v_ref, mask_ref, o_ref = refs
    else:
        q_ref, k_ref, v_ref, o_ref = refs
        mask_ref = None

    tq, H = q_ref.shape
    S = k_ref.shape[0]
    D = H // head_num
    qi = pl.program_id(1)

    q = q_ref[...]            # (tq, H), input dtype
    k = k_ref[...]            # (S,  H)
    v = v_ref[...]            # (S,  H)

    if causal:
        # In-kernel causal mask (no (S,S) HBM mask traffic).
        row = lax.broadcasted_iota(jnp.int32, (tq, S), 0) + qi * tq
        col = lax.broadcasted_iota(jnp.int32, (tq, S), 1)
        keep = col <= row
    elif has_mask:
        keep = mask_ref[...] == 0       # 0 = keep, nonzero = masked
    else:
        keep = None

    outs = []
    for h in range(head_num):           # statically unrolled over heads
        sl = slice(h * D, (h + 1) * D)
        qh, kh, vh = q[:, sl], k[:, sl], v[:, sl]

        # scores: q @ k^T, transpose folded into the MXU feed, f32 accumulate.
        s = lax.dot_general(qh, kh, (((1,), (1,)), ((), ())),
                            preferred_element_type=jnp.float32)   # (tq, S)
        s = s * scale
        if keep is not None:
            # TODO(synk): a fully-masked row (possible only with a pathological
            # explicit mask) yields an arbitrary (uniform) row instead of NaN.
            s = jnp.where(keep, s, -1e30)

        m = jnp.max(s, axis=-1, keepdims=True)                    # (tq, 1)
        p = jnp.exp(s - m)                                        # (tq, S) f32
        l = jnp.sum(p, axis=-1, keepdims=True)                    # (tq, 1)

        pv = lax.dot_general(p.astype(vh.dtype), vh,
                             (((1,), (0,)), ((), ())),
                             preferred_element_type=jnp.float32)  # (tq, D)
        outs.append(pv * (1.0 / l))

    # single lane-dense (tq, H) store
    o_ref[...] = jnp.concatenate(outs, axis=-1).astype(o_ref.dtype)


def flash_self_attention(q, k, v, attention_mask, head_num,
                         softmax_scale=None, causal=False, tq=128):
    """q, k, v: (S, B, H) 'SBH' with H = head_num * head_dim.
    attention_mask: (S, S) bool, True = masked.  When causal=True the mask is
    generated in-kernel (matches the test's upper-triangular atten_mask with
    pre_tockens=S, next_tockens=0) and attention_mask is not read.
    Returns (S, B, H). Dropout is not applied (keep_prob=1.0 in the spec)."""
    S, B, H = q.shape
    assert H % head_num == 0
    D = H // head_num
    scale = float(softmax_scale) if softmax_scale is not None else 1.0 / math.sqrt(D)

    has_mask = (not causal) and (attention_mask is not None)

    tq = min(tq, S)
    assert S % tq == 0, "seq length must divide the q tile size"

    # Free row-major views (no HBM transpose): (S, B, H) -> (S, B*H).
    q2 = q.reshape(S, B * H)
    k2 = k.reshape(S, B * H)
    v2 = v.reshape(S, B * H)
    nq = S // tq

    in_specs = [
        pl.BlockSpec((tq, H), lambda b, qi: (qi, b)),   # q tile
        pl.BlockSpec((S, H), lambda b, qi: (0, b)),     # full K for batch b
        pl.BlockSpec((S, H), lambda b, qi: (0, b)),     # full V for batch b
    ]
    inputs = [q2, k2, v2]
    if has_mask:
        in_specs.append(pl.BlockSpec((tq, S), lambda b, qi: (qi, 0)))
        inputs.append(attention_mask.astype(jnp.int32))

    kernel = functools.partial(_attn_kernel, scale=scale, head_num=head_num,
                               causal=causal, has_mask=has_mask)

    out2 = pl.pallas_call(
        kernel,
        out_shape=jax.ShapeDtypeStruct((S, B * H), q.dtype),
        grid_spec=pltpu.PrefetchScalarGridSpec(
            num_scalar_prefetch=0,
            grid=(B, nq),
            in_specs=in_specs,
            out_specs=pl.BlockSpec((tq, H), lambda b, qi: (qi, b)),
        ),
        compiler_params=pltpu.CompilerParams(
            dimension_semantics=("parallel", "parallel")),
    )(*inputs)

    # Free row-major reshape back to 'SBH'.
    return out2.reshape(S, B, H)


def _reference(q, k, v, attention_mask, head_num, scale):
    S, B, H = q.shape
    D = H // head_num
    qb = q.reshape(S, B, head_num, D).transpose(1, 2, 0, 3).astype(jnp.float32)
    kb = k.reshape(S, B, head_num, D).transpose(1, 2, 0, 3).astype(jnp.float32)
    vb = v.reshape(S, B, head_num, D).transpose(1, 2, 0, 3).astype(jnp.float32)
    s = jnp.einsum("bhqd,bhkd->bhqk", qb, kb) * scale
    s = jnp.where(attention_mask[None, None], -jnp.inf, s)
    p = jax.nn.softmax(s, axis=-1)
    o = jnp.einsum("bhqk,bhkd->bhqd", p, vb)
    return o.transpose(2, 0, 1, 3).reshape(S, B, H).astype(q.dtype)


if __name__ == "__main__":
    # FlashSelfAttention has no learned parameters (causal/scale/dropout only).
    S, B, head_num, head_dim = 128, 2, 4, 32
    H = head_num * head_dim
    scale = 1.0 / math.sqrt(head_dim)

    key = jax.random.PRNGKey(0)
    kq, kk, kv = jax.random.split(key, 3)
    q = jax.random.normal(kq, (S, B, H), jnp.float32)
    k = jax.random.normal(kk, (S, B, H), jnp.float32)
    v = jax.random.normal(kv, (S, B, H), jnp.float32)

    # causal mask matching npu_fusion_attention(pre_tockens=S, next_tockens=0):
    # True above the diagonal = masked future positions.
    attention_mask = jnp.triu(jnp.ones((S, S), dtype=jnp.bool_), k=1)

    ref = _reference(q, k, v, attention_mask, head_num, scale)

    # Optimized causal path (in-kernel mask). tq=64 exercises the q-tiling.
    out = flash_self_attention(q, k, v, attention_mask, head_num,
                               softmax_scale=scale, causal=True, tq=64)
    out = jax.block_until_ready(out)
    assert out.shape == (S, B, H)
    assert jnp.allclose(out, ref, atol=2e-3, rtol=2e-3), "causal path mismatch"

    # General explicit-mask path (same mask, passed explicitly).
    out_m = flash_self_attention(q, k, v, attention_mask, head_num,
                                 softmax_scale=scale, causal=False, tq=64)
    out_m = jax.block_until_ready(out_m)
    assert jnp.allclose(out_m, ref, atol=2e-3, rtol=2e-3), "masked path mismatch"

    print("KERNEL_OK")
</pallas_src>

<mosaic_0001>
module attributes {stable_mosaic.version = 11 : i64} {
  func.func @_attn_kernel(%arg0: i32, %arg1: i32, %arg2: memref<64x128xf32, #tpu.memory_space<vmem>>, %arg3: memref<128x128xf32, #tpu.memory_space<vmem>>, %arg4: memref<128x128xf32, #tpu.memory_space<vmem>>, %arg5: memref<64x128xf32, #tpu.memory_space<vmem>>) attributes {dimension_semantics = [#tpu.dimension_semantics<parallel>, #tpu.dimension_semantics<parallel>], iteration_bounds = array<i64: 2, 2>, scalar_prefetch = 0 : i64, scratch_operands = 0 : i64, tpu.core_type = #tpu.core_type<tc>, window_params = [{transform_indices = @transform_0, window_bounds = array<i64: 64, 128>}, {transform_indices = @transform_1, window_bounds = array<i64: 128, 128>}, {transform_indices = @transform_2, window_bounds = array<i64: 128, 128>}, {transform_indices = @transform_3, window_bounds = array<i64: 64, 128>}]} {
    %c0 = arith.constant 0 : index
    %c0_0 = arith.constant 0 : index
    %0 = vector.load %arg2[%c0, %c0_0] : memref<64x128xf32, #tpu.memory_space<vmem>>, vector<64x128xf32>
    %c0_1 = arith.constant 0 : index
    %c0_2 = arith.constant 0 : index
    %1 = vector.load %arg3[%c0_1, %c0_2] : memref<128x128xf32, #tpu.memory_space<vmem>>, vector<128x128xf32>
    %c0_3 = arith.constant 0 : index
    %c0_4 = arith.constant 0 : index
    %2 = vector.load %arg4[%c0_3, %c0_4] : memref<128x128xf32, #tpu.memory_space<vmem>>, vector<128x128xf32>
    %3 = tpu.iota {dimensions = array<i32: 0>} : vector<64x128xi32>
    %c64_i32 = arith.constant 64 : i32
    %4 = arith.muli %arg1, %c64_i32 : i32
    %5 = vector.broadcast %4 : i32 to vector<64x128xi32>
    %6 = arith.addi %3, %5 : vector<64x128xi32>
    %7 = tpu.iota {dimensions = array<i32: 1>} : vector<64x128xi32>
    %8 = arith.cmpi sle, %7, %6 : vector<64x128xi32>
    %9 = vector.extract_strided_slice %0 {offsets = [0, 0], sizes = [64, 32], strides = [1, 1]} : vector<64x128xf32> to vector<64x32xf32>
    %10 = vector.extract_strided_slice %1 {offsets = [0, 0], sizes = [128, 32], strides = [1, 1]} : vector<128x128xf32> to vector<128x32xf32>
    %11 = vector.extract_strided_slice %2 {offsets = [0, 0], sizes = [128, 32], strides = [1, 1]} : vector<128x128xf32> to vector<128x32xf32>
    %cst = arith.constant dense<0.000000e+00> : vector<64x128xf32>
    %12 = tpu.matmul %9, %10, %cst {dimension_numbers = #tpu.dot_dimension_numbers<[1], [1], [0], [0], [0, 0, 1, 0], [], []>} : vector<64x32xf32>, vector<128x32xf32>, vector<64x128xf32> -> vector<64x128xf32>
    %cst_5 = arith.constant 0.176776692 : f32
    %13 = vector.broadcast %cst_5 : f32 to vector<64x128xf32>
    %14 = arith.mulf %12, %13 : vector<64x128xf32>
    %cst_6 = arith.constant -1.000000e+30 : f32
    %15 = vector.broadcast %cst_6 : f32 to vector<64x128xf32>
    %16 = arith.select %8, %14, %15 : vector<64x128xi1>, vector<64x128xf32>
    %cst_7 = arith.constant dense<0xFF800000> : vector<64xf32>
    %17 = vector.multi_reduction <maximumf>, %16, %cst_7 [1] : vector<64x128xf32> to vector<64xf32>
    %18 = vector.shape_cast %17 : vector<64xf32> to vector<64x1xf32>
    %19 = vector.broadcast %18 : vector<64x1xf32> to vector<64x128xf32>
    %20 = arith.subf %16, %19 : vector<64x128xf32>
    %21 = math.exp %20 : vector<64x128xf32>
    %cst_8 = arith.constant dense<0.000000e+00> : vector<64xf32>
    %22 = vector.multi_reduction <add>, %21, %cst_8 [1] : vector<64x128xf32> to vector<64xf32>
    %23 = vector.shape_cast %22 : vector<64xf32> to vector<64x1xf32>
    %cst_9 = arith.constant dense<0.000000e+00> : vector<64x32xf32>
    %24 = tpu.matmul %21, %11, %cst_9 {dimension_numbers = #tpu.dot_dimension_numbers<[1], [0], [0], [1], [0, 0, 1, 1], [], []>} : vector<64x128xf32>, vector<128x32xf32>, vector<64x32xf32> -> vector<64x32xf32>
    %cst_10 = arith.constant 1.000000e+00 : f32
    %25 = vector.broadcast %cst_10 : f32 to vector<64x1xf32>
    %26 = arith.divf %25, %23 : vector<64x1xf32>
    %27 = vector.broadcast %26 : vector<64x1xf32> to vector<64x32xf32>
    %28 = arith.mulf %24, %27 : vector<64x32xf32>
    %29 = vector.extract_strided_slice %0 {offsets = [0, 32], sizes = [64, 32], strides = [1, 1]} : vector<64x128xf32> to vector<64x32xf32>
    %30 = vector.extract_strided_slice %1 {offsets = [0, 32], sizes = [128, 32], strides = [1, 1]} : vector<128x128xf32> to vector<128x32xf32>
    %31 = vector.extract_strided_slice %2 {offsets = [0, 32], sizes = [128, 32], strides = [1, 1]} : vector<128x128xf32> to vector<128x32xf32>
    %cst_11 = arith.constant dense<0.000000e+00> : vector<64x128xf32>
    %32 = tpu.matmul %29, %30, %cst_11 {dimension_numbers = #tpu.dot_dimension_numbers<[1], [1], [0], [0], [0, 0, 1, 0], [], []>} : vector<64x32xf32>, vector<128x32xf32>, vector<64x128xf32> -> vector<64x128xf32>
    %cst_12 = arith.constant 0.176776692 : f32
    %33 = vector.broadcast %cst_12 : f32 to vector<64x128xf32>
    %34 = arith.mulf %32, %33 : vector<64x128xf32>
    %cst_13 = arith.constant -1.000000e+30 : f32
    %35 = vector.broadcast %cst_13 : f32 to vector<64x128xf32>
    %36 = arith.select %8, %34, %35 : vector<64x128xi1>, vector<64x128xf32>
    %cst_14 = arith.constant dense<0xFF800000> : vector<64xf32>
    %37 = vector.multi_reduction <maximumf>, %36, %cst_14 [1] : vector<64x128xf32> to vector<64xf32>
    %38 = vector.shape_cast %37 : vector<64xf32> to vector<64x1xf32>
    %39 = vector.broadcast %38 : vector<64x1xf32> to vector<64x128xf32>
    %40 = arith.subf %36, %39 : vector<64x128xf32>
    %41 = math.exp %40 : vector<64x128xf32>
    %cst_15 = arith.constant dense<0.000000e+00> : vector<64xf32>
    %42 = vector.multi_reduction <add>, %41, %cst_15 [1] : vector<64x128xf32> to vector<64xf32>
    %43 = vector.shape_cast %42 : vector<64xf32> to vector<64x1xf32>
    %cst_16 = arith.constant dense<0.000000e+00> : vector<64x32xf32>
    %44 = tpu.matmul %41, %31, %cst_16 {dimension_numbers = #tpu.dot_dimension_numbers<[1], [0], [0], [1], [0, 0, 1, 1], [], []>} : vector<64x128xf32>, vector<128x32xf32>, vector<64x32xf32> -> vector<64x32xf32>
    %cst_17 = arith.constant 1.000000e+00 : f32
    %45 = vector.broadcast %cst_17 : f32 to vector<64x1xf32>
    %46 = arith.divf %45, %43 : vector<64x1xf32>
    %47 = vector.broadcast %46 : vector<64x1xf32> to vector<64x32xf32>
    %48 = arith.mulf %44, %47 : vector<64x32xf32>
    %49 = vector.extract_strided_slice %0 {offsets = [0, 64], sizes = [64, 32], strides = [1, 1]} : vector<64x128xf32> to vector<64x32xf32>
    %50 = vector.extract_strided_slice %1 {offsets = [0, 64], sizes = [128, 32], strides = [1, 1]} : vector<128x128xf32> to vector<128x32xf32>
    %51 = vector.extract_strided_slice %2 {offsets = [0, 64], sizes = [128, 32], strides = [1, 1]} : vector<128x128xf32> to vector<128x32xf32>
    %cst_18 = arith.constant dense<0.000000e+00> : vector<64x128xf32>
    %52 = tpu.matmul %49, %50, %cst_18 {dimension_numbers = #tpu.dot_dimension_numbers<[1], [1], [0], [0], [0, 0, 1, 0], [], []>} : vector<64x32xf32>, vector<128x32xf32>, vector<64x128xf32> -> vector<64x128xf32>
    %cst_19 = arith.constant 0.176776692 : f32
    %53 = vector.broadcast %cst_19 : f32 to vector<64x128xf32>
    %54 = arith.mulf %52, %53 : vector<64x128xf32>
    %cst_20 = arith.constant -1.000000e+30 : f32
    %55 = vector.broadcast %cst_20 : f32 to vector<64x128xf32>
    %56 = arith.select %8, %54, %55 : vector<64x128xi1>, vector<64x128xf32>
    %cst_21 = arith.constant dense<0xFF800000> : vector<64xf32>
    %57 = vector.multi_reduction <maximumf>, %56, %cst_21 [1] : vector<64x128xf32> to vector<64xf32>
    %58 = vector.shape_cast %57 : vector<64xf32> to vector<64x1xf32>
    %59 = vector.broadcast %58 : vector<64x1xf32> to vector<64x128xf32>
    %60 = arith.subf %56, %59 : vector<64x128xf32>
    %61 = math.exp %60 : vector<64x128xf32>
    %cst_22 = arith.constant dense<0.000000e+00> : vector<64xf32>
    %62 = vector.multi_reduction <add>, %61, %cst_22 [1] : vector<64x128xf32> to vector<64xf32>
    %63 = vector.shape_cast %62 : vector<64xf32> to vector<64x1xf32>
    %cst_23 = arith.constant dense<0.000000e+00> : vector<64x32xf32>
    %64 = tpu.matmul %61, %51, %cst_23 {dimension_numbers = #tpu.dot_dimension_numbers<[1], [0], [0], [1], [0, 0, 1, 1], [], []>} : vector<64x128xf32>, vector<128x32xf32>, vector<64x32xf32> -> vector<64x32xf32>
    %cst_24 = arith.constant 1.000000e+00 : f32
    %65 = vector.broadcast %cst_24 : f32 to vector<64x1xf32>
    %66 = arith.divf %65, %63 : vector<64x1xf32>
    %67 = vector.broadcast %66 : vector<64x1xf32> to vector<64x32xf32>
    %68 = arith.mulf %64, %67 : vector<64x32xf32>
    %69 = vector.extract_strided_slice %0 {offsets = [0, 96], sizes = [64, 32], strides = [1, 1]} : vector<64x128xf32> to vector<64x32xf32>
    %70 = vector.extract_strided_slice %1 {offsets = [0, 96], sizes = [128, 32], strides = [1, 1]} : vector<128x128xf32> to vector<128x32xf32>
    %71 = vector.extract_strided_slice %2 {offsets = [0, 96], sizes = [128, 32], strides = [1, 1]} : vector<128x128xf32> to vector<128x32xf32>
    %cst_25 = arith.constant dense<0.000000e+00> : vector<64x128xf32>
    %72 = tpu.matmul %69, %70, %cst_25 {dimension_numbers = #tpu.dot_dimension_numbers<[1], [1], [0], [0], [0, 0, 1, 0], [], []>} : vector<64x32xf32>, vector<128x32xf32>, vector<64x128xf32> -> vector<64x128xf32>
    %cst_26 = arith.constant 0.176776692 : f32
    %73 = vector.broadcast %cst_26 : f32 to vector<64x128xf32>
    %74 = arith.mulf %72, %73 : vector<64x128xf32>
    %cst_27 = arith.constant -1.000000e+30 : f32
    %75 = vector.broadcast %cst_27 : f32 to vector<64x128xf32>
    %76 = arith.select %8, %74, %75 : vector<64x128xi1>, vector<64x128xf32>
    %cst_28 = arith.constant dense<0xFF800000> : vector<64xf32>
    %77 = vector.multi_reduction <maximumf>, %76, %cst_28 [1] : vector<64x128xf32> to vector<64xf32>
    %78 = vector.shape_cast %77 : vector<64xf32> to vector<64x1xf32>
    %79 = vector.broadcast %78 : vector<64x1xf32> to vector<64x128xf32>
    %80 = arith.subf %76, %79 : vector<64x128xf32>
    %81 = math.exp %80 : vector<64x128xf32>
    %cst_29 = arith.constant dense<0.000000e+00> : vector<64xf32>
    %82 = vector.multi_reduction <add>, %81, %cst_29 [1] : vector<64x128xf32> to vector<64xf32>
    %83 = vector.shape_cast %82 : vector<64xf32> to vector<64x1xf32>
    %cst_30 = arith.constant dense<0.000000e+00> : vector<64x32xf32>
    %84 = tpu.matmul %81, %71, %cst_30 {dimension_numbers = #tpu.dot_dimension_numbers<[1], [0], [0], [1], [0, 0, 1, 1], [], []>} : vector<64x128xf32>, vector<128x32xf32>, vector<64x32xf32> -> vector<64x32xf32>
    %cst_31 = arith.constant 1.000000e+00 : f32
    %85 = vector.broadcast %cst_31 : f32 to vector<64x1xf32>
    %86 = arith.divf %85, %83 : vector<64x1xf32>
    %87 = vector.broadcast %86 : vector<64x1xf32> to vector<64x32xf32>
    %88 = arith.mulf %84, %87 : vector<64x32xf32>
    %89 = tpu.concatenate %28, %48, %68, %88 in 1 : vector<64x32xf32>, vector<64x32xf32>, vector<64x32xf32>, vector<64x32xf32> -> vector<64x128xf32>
    %c0_32 = arith.constant 0 : index
    %c0_33 = arith.constant 0 : index
    %90 = vector.load %arg5[%c0_32, %c0_33] : memref<64x128xf32, #tpu.memory_space<vmem>>, vector<64x128xf32>
    tpu.vector_store %arg5[%c0_32, %c0_33], %89 {strides = array<i32>} : memref<64x128xf32, #tpu.memory_space<vmem>>, vector<64x128xf32>,
    return
  }
  func.func @transform_0(%arg0: i32, %arg1: i32) -> (i32, i32) {
    %c0_i32 = arith.constant 0 : i32
    return %arg1, %arg0 : i32, i32
  }
  func.func @transform_1(%arg0: i32, %arg1: i32) -> (i32, i32) {
    %c0_i32 = arith.constant 0 : i32
    %c0_i32_0 = arith.constant 0 : i32
    return %c0_i32, %arg0 : i32, i32
  }
  func.func @transform_2(%arg0: i32, %arg1: i32) -> (i32, i32) {
    %c0_i32 = arith.constant 0 : i32
    %c0_i32_0 = arith.constant 0 : i32
    return %c0_i32, %arg0 : i32, i32
  }
  func.func @transform_3(%arg0: i32, %arg1: i32) -> (i32, i32) {
    %c0_i32 = arith.constant 0 : i32
    return %arg1, %arg0 : i32, i32
  }
}

</mosaic_0001>

<bundles_post_ra>
// kernel: tpu_custom_call.1
= control target key start
LH: loop header
LB: loop body
LE: loop exit
PB: predicated region body
PF: predicated region fallthrough
CT: control target
= control target key end

     0   :  { %s5509_s0 = inlined_call_operand.hbm [shape: f32[128,256], index: 0, kind: input, shape index: {}]   ;;  %s5510_s1 = inlined_call_operand.hbm [shape: f32[128,256], index: 1, kind: input, shape index: {}]   ;;  %s5511_s2 = inlined_call_operand.hbm [shape: f32[128,256], index: 2, kind: input, shape index: {}]   ;;  %s5512_s3 = inlined_call_operand.hbm [shape: f32[128,256], index: 3, kind: output, shape index: {}]  }
   0x1   :  { %5540 = sst [smem:[#allocation29_spill]] %s5510_s1 }
   0x2   :  { %5541 = sst [smem:[#allocation30_spill]] %s5512_s3 }
   0x3   :  { %8 = vsyncpa [#allocation3], 0 }
   0x4   :  { %10 = vsyncpa [#allocation3 + $0x1], 0 }
   0x5   :  { %11 = vsyncpa [#allocation6], 0 }
   0x6   :  { %13 = vsyncpa [#allocation6 + $0x1], 0 }
   0x7   :  { %14 = vsyncpa [#allocation4], 0 }
   0x8   :  { %16 = vsyncpa [#allocation4 + $0x1], 0  ;;  %s4141_s12 = smov 0   ;;  %s4143_s13 = smov 0  }
   0x9   :  { %s4145_s14 = smov 0   ;;  %s4147_s15 = smov 0  }
   0xa   :  { %s4149_s16 = smov 0   ;;  %s4151_s17 = smov 0  }
   0xb   :  { %s4153_s18 = smov 0   ;;  %s4155_s19 = smov 0  }
   0xc   :  { %s4157_s20 = smov 0   ;;  %s4159_s21 = smov 0  }
   0xd   :  { %s4161_s22 = smov 0  }
   0xe LB: > { %5542 = sst [smem:[#allocation12_spill]] %s4070_s13  ;;  %s4195_s23 = sadd.s32 4294967295, %s4106_s22   ;;  %s4106_s22 = sphi %s4161_s22, %s22_s22   ;;  %s4102_s21 = sphi %s4159_s21, %s5610_s21   ;;  %s4098_s20 = sphi %s4157_s20, %s5609_s20   ;;  %s4094_s19 = sphi %s4155_s19, %s5608_s19   ;;  %s4090_s18 = sphi %s4153_s18, %s5607_s18   ;;  %s4086_s17 = sphi %s4151_s17, %s5606_s17   ;;  %s4082_s16 = sphi %s4149_s16, %s5605_s16   ;;  %s4078_s15 = sphi %s4147_s15, %s5604_s15   ;;  %s4074_s14 = sphi %s4145_s14, %s5603_s14   ;;  %s4070_s13 = sphi %s4143_s13, %s5602_s13   ;;  %s4066_s12 = sphi %s4141_s12, %s5599_s12  }
   0xf   : > { %5543 = sst [smem:[#allocation13_spill]] %s4078_s15  ;;  %p5515_p0 = scmp.eq.s32.totalorder %s4106_s22, 0 }
  0x10   : > { %5544 = sst [smem:[#allocation14_spill]] %s4090_s18  ;;  %p5516_p1 = scmp.eq.s32.totalorder %s4195_s23, 0 }
  0x11   : > { %5545 = sst [smem:[#allocation15_spill]] %s4094_s19  ;;  %p76_p2 = scmp.ne.s32.totalorder %s4074_s14, %s4070_s13 }
  0x12   : > { %p82_p3 = scmp.ne.s32.totalorder %s4070_s13, %s4066_s12  ;;  %p5514_p5 = scmp.lt.s32.totalorder %s4106_s22, 4 }
  0x13   : > { %p78_p4 = por %p76_p2, %p5515_p0  ;;  %s183_s26 = sand.u32 1, %s4106_s22  }
  0x14   : > { %p4208_p6 = por %p82_p3, %p5516_p1  ;;  %s185_s27 = sand.u32 1, %s4074_s14  }
  0x15   : > { %s4214_s28 = sshll.u32 %s185_s27, 7  ;;  %s2384_s29 = sshll.u32 %s4102_s21, 7 }
  0x16   : > { %s5546_s25 = scalar_select %p4208_p6, 1, 0 }
  0x17   : > { %s5548_s1 = sld [smem:[#allocation29_spill]]  ;;  %s187_s6 = scalar_lea.vmem [#allocation5], %s4214_s28 }
  0x18   : > { %5547 = sst [smem:[#allocation16_spill]] %s5546_s25  ;;  %s193_s7 = sshll.u32 %s187_s6, 4  ;;  %s4223_s7 = int_to_ptr.vmem [resolvable:$true] %s193_s7 }
  0x19   : > { %p4227_p7 = pnand %p5514_p5, %p78_p4  ;;  %s4235_s12 = scalar_lea.hbm %s5511_s2, %s2384_s29 }
  0x1a   : > { %s4237_s27 = scalar_lea.sflag [#allocation6], %s183_s26 }
  0x1b   : > { %p3892_p9 = pneg %p4227_p7 }
  0x1d   : > { %s4220_s5 = scalar_lea.hbm %s5548_s1, %s2384_s29  ;;  %s3895_s24 = scalar_lea.hbm %s5548_s1, 4096 }
  0x1e   : > { %s3890_s30 = scalar_lea.hbm %s4220_s5, 2048  ;;  %p3896_p12 = scmp.lt.u32.totalorder %s4220_s5, %s5548_s1 }
  0x1f   : > { %p3891_p8 = scmp.ne.s32.totalorder %s4220_s5, %s3890_s30  ;;  %p3897_p13 = scmp.lt.u32.totalorder %s3895_s24, %s3890_s30 }
  0x20   : > { %p3899_p3 = scmp.lt.u32.totalorder %s3890_s30, %s4220_s5 }
  0x21   : > { %p3893_p10 = pnand %p3892_p9, %p3891_p8  ;;  %p3898_p2 = por %p3897_p13, %p3896_p12 }
  0x23   : > { %p3894_p11 = pneg %p3893_p10  ;;  %p3900_p4 = por %p3899_p3, %p3898_p2 }
  0x25   : > { %p3901_p5 = pnand %p3900_p4, %p3894_p11 }
  0x27   : > { %3904 = shalt.err (!%p3901_p5)
}
  0x28   : > { %s3905_s26 = scalar_lea.vmem %s4223_s7, 2048  ;;  %s4108_s29 = smov [#allocation5]  }
  0x29   : > { %p3906_p8 = scmp.ne.s32.totalorder %s4223_s7, %s3905_s26  ;;  %s3910_s10 = sshll.u32 %s4108_s29, 4  ;;  %s3911_s10 = int_to_ptr.vmem [resolvable:$false] %s3910_s10 }
  0x2a   : > { %s3912_s3 = scalar_lea.vmem %s3911_s10, 4096  ;;  %p3913_p1 = scmp.lt.s32.totalorder %s4223_s7, %s3911_s10 }
  0x2b   : > { %p3908_p10 = pnand %p3906_p8, %p3892_p9  ;;  %p3914_p12 = scmp.lt.s32.totalorder %s3912_s3, %s3905_s26 }
  0x2d   : > { %p3909_p0 = pneg %p3908_p10  ;;  %p3915_p13 = por %p3914_p12, %p3913_p1 }
  0x2f   : > { %p3916_p2 = pnand %p3915_p13, %p3909_p0 }
  0x31   : > { %3919 = shalt.err (!%p3916_p2)
}
  0x32   : > { %s5517_s24 = smov 256   ;;  %s5519_s9 = smov 128  }
  0x33   : > { %s5521_s11 = smov 8   ;;  %s207_s30 = scalar_lea.vmem [#allocation7], %s4214_s28 }
  0x34   : > { %3375 = dma.hbm_to_vmem [thread:$0]  (!%p4227_p7), %s4220_s5, 2048, %s4223_s7, %s4237_s27, %s5517_s24, %s5519_s9, %s5521_s11  }
  0x35   : > { %s213_s4 = sshll.u32 %s207_s30, 4  ;;  %p2387_p0 = scmp.ge.s32.totalorder %s4106_s22, 1  ;;  %s4275_s4 = int_to_ptr.vmem [resolvable:$true] %s213_s4 }
  0x36   : > { %p221_p1 = scmp.lt.s32.totalorder %s4106_s22, 5  ;;  %s31_s26 = sadd.s32 1, %s4098_s20 }
  0x37   : > { %s2376_s29 = sadd.s32 4294967294, %s4106_s22   ;;  %p32_p11 = scmp.ge.s32.totalorder %s31_s26, 2 }
  0x38   : > { %p4271_p5 = pnand %p2387_p0, %p221_p1  ;;  %s43_s10 = sadd.s32 1, %s4086_s17 }
  0x39   : > { %p56_p3 = scmp.ne.s32.totalorder %s4082_s16, %s4078_s15  ;;  %s5612_s26 = smov (%p32_p11, %s31_s26), 0 }
  0x3a   : > { %s5550_s6 = scalar_select %p4271_p5, 1, 0 }
  0x3b   : > { %5551 = sst [smem:[#allocation17_spill]] %s5612_s26  ;;  %s5552_s28 = sadd.s32 1, %s4102_s21 }
  0x3c   : > { %s5614_s28 = smov (!%p32_p11, %s5552_s28), %s4102_s21  ;;  %s38_s5 = ssub.s32 %s4098_s20, %s5612_s26 }
  0x3d   : > { %p50_p4 = scmp.ne.s32.totalorder %s4086_s17, %s4082_s16  ;;  %p36_p8 = scmp.ge.s32.totalorder %s5614_s28, 2 }
  0x3e   : > { %p5553_p10 = scmp.eq.s32.totalorder %s4195_s23, 0  ;;  %p134_p13 = scmp.eq.s32.totalorder %s4195_s23, 3 }
  0x3f   : > { %p140_p2 = scmp.eq.s32.totalorder %s2376_s29, 3  ;;  %s5616_s28 = smov (%p36_p8, %s5614_s28), 0 }
  0x40   : > { %p4293_p12 = por %p5553_p10, %p56_p3  ;;  %5555 = sst [smem:[#allocation18_spill]] %s5616_s28 }
  0x41   : > { %p4300_p0 = por %p134_p13, %p50_p4  ;;  %p4304_p1 = por %p140_p2, %p56_p3 }
  0x42   : > { %s5554_s7 = scalar_select %p4293_p12, 1, 0 }
  0x43   : > { %s5556_s3 = scalar_select %p4300_p0, 1, 0 }
  0x44   : > { %s5558_s30 = scalar_select %p4304_p1, 1, 0 }
  0x45   : > { %5557 = sst [smem:[#allocation19_spill]] %s5556_s3  ;;  %s39_s24 = ssub.s32 %s4102_s21, %s5616_s28 }
  0x46   : > { %5559 = sst [smem:[#allocation20_spill]] %s5558_s30  ;;  %p5560_p11 = scmp.eq.s32.totalorder %s4106_s22, 0 }
  0x47   : > { %s40_s29 = sor.u32 %s39_s24, %s38_s5  ;;  %p67_p8 = scmp.eq.s32.totalorder %s39_s24, 0 }
  0x48   : > { %p4312_p10 = por %p5560_p11, %p50_p4  ;;  %p41_p13 = scmp.eq.s32.totalorder %s40_s29, 0 }
  0x49   : > { %s160_s11 = sand.u32 1, %s4086_s17   ;;  %s5562_s1 = sadd.s32 1, %s4074_s14 }
  0x4a   : > { %s4320_s26 = scalar_select %p67_p8, %s4074_s14, %s5562_s1  }
  0x4b   : > { %s4323_s30 = scalar_select %p41_p13, %s4086_s17, %s43_s10  }
  0x4c   : > { %s2379_s28 = sshll.u32 %s160_s11, 6  ;;  %s2495_s15 = sshll.u32 %s4098_s20, 4 }
  0x4d   : > { %s170_s3 = sadd.s32 %s4102_s21, %s2495_s15  ;;  %s164_s18 = scalar_lea.vmem [#allocation2], %s2379_s28 }
  0x4e   : > { %s2382_s19 = sshll.u32 %s170_s3, 7  ;;  %s173_s25 = sshll.u32 %s164_s18, 4  ;;  %s4334_s25 = int_to_ptr.vmem [resolvable:$true] %s173_s25 }
  0x4f   : > { %s4332_s24 = scalar_lea.hbm %s5509_s0, %s2382_s19  ;;  %p5563_p3 = scmp.lt.s32.totalorder %s4106_s22, 4 }
  0x50   : > { %s3920_s10 = scalar_lea.hbm %s4235_s12, 2048  ;;  %s3925_s13 = scalar_lea.hbm %s5511_s2, 4096 }
  0x51   : > { %p4340_p4 = pnand %p5563_p3, %p4312_p10  ;;  %p3921_p2 = scmp.ne.s32.totalorder %s4235_s12, %s3920_s10 }
  0x52   : > { %p3926_p13 = scmp.lt.u32.totalorder %s4235_s12, %s5511_s2  ;;  %p3927_p1 = scmp.lt.u32.totalorder %s3925_s13, %s3920_s10 }
  0x53   : > { %p3923_p11 = pnand %p3921_p2, %p3892_p9  ;;  %p3929_p10 = scmp.lt.u32.totalorder %s3920_s10, %s4235_s12 }
  0x54   : > { %p3928_p0 = por %p3927_p1, %p3926_p13 }
  0x55   : > { %p3924_p8 = pneg %p3923_p11 }
  0x56   : > { %p3930_p3 = por %p3929_p10, %p3928_p0 }
  0x58   : > { %p3931_p6 = pnand %p3930_p3, %p3924_p8 }
  0x5a   : > { %3934 = shalt.err (!%p3931_p6)
}
  0x5b   : > { %s3935_s9 = scalar_lea.vmem %s4275_s4, 2048  ;;  %s4112_s3 = smov [#allocation7]  }
  0x5c   : > { %p3936_p2 = scmp.ne.s32.totalorder %s4275_s4, %s3935_s9  ;;  %s3940_s29 = sshll.u32 %s4112_s3, 4  ;;  %s3941_s29 = int_to_ptr.vmem [resolvable:$false] %s3940_s29 }
  0x5d   : > { %s3942_s5 = scalar_lea.vmem %s3941_s29, 4096  ;;  %p3943_p5 = scmp.lt.s32.totalorder %s4275_s4, %s3941_s29 }
  0x5e   : > { %p3938_p11 = pnand %p3936_p2, %p3892_p9  ;;  %p3944_p1 = scmp.lt.s32.totalorder %s3942_s5, %s3935_s9 }
  0x60   : > { %p3939_p12 = pneg %p3938_p11  ;;  %p3945_p13 = por %p3944_p1, %p3943_p5 }
  0x62   : > { %p3946_p0 = pnand %p3945_p13, %p3939_p12 }
  0x64   : > { %3949 = shalt.err (!%p3946_p0)
}
  0x65   : > { %s5565_s10 = smov 8   ;;  %s5566_s15 = smov 128  }
  0x66   : > { %s5567_s18 = smov 256   ;;  %s4373_s13 = scalar_lea.sflag [#allocation3], %s160_s11 }
  0x67   : > { %3378 = dma.hbm_to_vmem [thread:$0]  (!%p4227_p7), %s4235_s12, 2048, %s4275_s4, %s4237_s27, %s5567_s18, %s5566_s15, %s5565_s10  }
  0x68   : > { %s3950_s19 = scalar_lea.hbm %s4332_s24, 1024  ;;  %p3952_p9 = pneg %p4340_p4 }
  0x69   : > { %p3951_p6 = scmp.ne.s32.totalorder %s4332_s24, %s3950_s19  ;;  %s3955_s9 = scalar_lea.hbm %s5509_s0, 4096 }
  0x6a   : > { %p3956_p8 = scmp.lt.u32.totalorder %s4332_s24, %s5509_s0  ;;  %p3957_p7 = scmp.lt.u32.totalorder %s3955_s9, %s3950_s19 }
  0x6b   : > { %p3953_p5 = pnand %p3952_p9, %p3951_p6  ;;  %p3959_p3 = scmp.lt.u32.totalorder %s3950_s19, %s4332_s24 }
  0x6c   : > { %p3958_p10 = por %p3957_p7, %p3956_p8 }
  0x6d   : > { %p3954_p12 = pneg %p3953_p5 }
  0x6e   : > { %p3960_p2 = por %p3959_p3, %p3958_p10 }
  0x70   : > { %p3961_p11 = pnand %p3960_p2, %p3954_p12 }
  0x72   : > { %3964 = shalt.err (!%p3961_p11)
}
  0x73   : > { %s3965_s12 = scalar_lea.vmem %s4334_s25, 1024  ;;  %s4113_s27 = smov [#allocation2]  }
  0x74   : > { %p3966_p1 = scmp.ne.s32.totalorder %s4334_s25, %s3965_s12  ;;  %s3970_s11 = sshll.u32 %s4113_s27, 4  ;;  %s3971_s11 = int_to_ptr.vmem [resolvable:$false] %s3970_s11 }
  0x75   : > { %s3972_s4 = scalar_lea.vmem %s3971_s11, 2048  ;;  %p3973_p6 = scmp.lt.s32.totalorder %s4334_s25, %s3971_s11 }
  0x76   : > { %p3968_p13 = pnand %p3966_p1, %p3952_p9  ;;  %p3974_p5 = scmp.lt.s32.totalorder %s3972_s4, %s3965_s12 }
  0x78   : > { %p3969_p0 = pneg %p3968_p13  ;;  %p3975_p8 = por %p3974_p5, %p3973_p6 }
  0x7a   : > { %p3976_p7 = pnand %p3975_p8, %p3969_p0 }
  0x7c   : > { %3979 = shalt.err (!%p3976_p7)
}
  0x7d   : > { %3372 = dma.hbm_to_vmem [thread:$0]  (!%p4340_p4), %s4332_s24, 1024, %s4334_s25, %s4373_s13, %s5567_s18, %s5566_s15, %s5565_s10  }
  0x7e   : > { %p5568_p9 = scmp.ne.s32.totalorder %s5550_s6, 0 }
  0x80   : > { %225 = sbr.rel (%p5568_p9) target bundleno = 2338 (0x922), region = 32 }
  0x87   : > { %s4407_s5 = sand.u32 1, %s4082_s16   ;;  %p5569_p12 = scmp.ne.s32.totalorder %s5554_s7, 0 }
  0x88   : > { %s2388_s19 = sshll.u32 %s4407_s5, 6  ;;  %s228_s8 = scalar_lea.sflag [#allocation3], %s4407_s5 }
  0x89   : > { %s4413_s1 = scalar_lea.vmem [#allocation2], %s2388_s19 }
  0x8a   : > { %4053 = dma.done.wait (%p5569_p12), %s228_s8, 1024  }
  0x8b   : > { %4055 = vsyncadd (%p5569_p12), %s228_s8, 4294966272  ;;  %s5570_s25 = sld [smem:[#allocation12_spill]]  ;;  %s5571_s6 = sld [smem:[#allocation16_spill]] }
  0x8c   : > { %s236_s24 = sand.u32 1, %s4195_s23  }
  0x8d   : > { %s237_s18 = scalar_lea.sflag [#allocation6], %s236_s24 }
  0x91   : > { %s238_s10 = sand.u32 1, %s5570_s25   ;;  %p5572_p4 = scmp.ne.s32.totalorder %s5571_s6, 0 }
  0x92   : > { %s4421_s15 = sshll.u32 %s238_s10, 7 }
  0x93   : > { %s4424_s13 = scalar_lea.vmem [#allocation5], %s4421_s15 }
  0x94   : > { %4057 = dma.done.wait (%p5572_p4), %s237_s18, 4096  }
  0x95   : > { %4059 = vsyncadd (%p5572_p4), %s237_s18, 4294963200  ;;  %vm353_vm0 = vcmask 261120   ;;  %v292_v1 = vld [vmem:[%s4424_s13] sm:$0xff]  ;;  %v293_v2 = vld [vmem:[%s4424_s13 + $0x8] sm:$0xff]  ;;  %s4114_s23 = smov 96   ;;  %s5578_s7 = sld [smem:[#allocation14_spill]]  ;;  %v324_v43 = vlaneseq }
  0x96   : > { %vm4432_vm1 = vmpackc.low %vm353_vm0, %vm353_vm0  ;;  %v294_v3 = vld [vmem:[%s4424_s13 + $0x10] sm:$0xff]  ;;  %v3041_v4 = vpack.c.bf16 %v293_v2, %v292_v1  ;;  %v295_v5 = vld [vmem:[%s4424_s13 + $0x18] sm:$0xff]  ;;  %v4442_v8 = vpack.i.bf16 %v293_v2, %v292_v1  ;;  %s4565_s28 = scalar_lea.vmem [#allocation7], %s4421_s15  ;;  %s4115_s3 = smov 64   ;;  %vm2202_vm10 = vcmask 523264   ;;  %vm2211_vm11 = vcmask 785408  }
  0x97   : > { %v296_v6 = vld [vmem:[%s4424_s13 + $0x20] sm:$0xff]  ;;  %v297_v7 = vld [vmem:[%s4424_s13 + $0x28] sm:$0xff]  ;;  %v3047_v9 = vpack.c.bf16 %v295_v5, %v294_v3  ;;  %v4450_v11 = vpack.i.bf16 %v295_v5, %v294_v3  ;;  %v4476_v17 = vld [vmem:[%s4424_s13 + $0x30] sm:$0xff]  ;;  %v4583_v44 = vshrl.u32 %v324_v43, 7  ;;  %v4597_v50 = vand.u32 127, %v324_v43  ;;  %s4116_s29 = smov 32  }
  0x98   : > { %v4444_v10 = vpack.i.bf16 %v297_v7, %v296_v6  ;;  %3043 = vmatprep.subr.msk.bf16.mxu0 %vm4432_vm1, %v3041_v4  ;;  %3483 = vrot.lane.b32.xlu1 %v4442_v8, %s4114_s23  ;;  %v4459_v12 = vld [vmem:[%s4413_s1] sm:$0xff]  ;;  %v301_v14 = vld [vmem:[%s4424_s13 + $0x48] sm:$0xff]  ;;  %v3053_v16 = vpack.c.bf16 %v297_v7, %v296_v6  ;;  %v4479_v18 = vld [vmem:[%s4424_s13 + $0x38] sm:$0xff]  ;;  %s5403_s12 = scalar_lea.vmem [#allocation8], %s2388_s19  ;;  %s5588_s27 = sld [smem:[#allocation15_spill]] }
  0x99   : > { %3046 = vmatpush3.bf16.xpose.msk.msra.mxu0 %vm4432_vm1, %v3041_v4  ;;  %v300_v13 = vld [vmem:[%s4424_s13 + $0x40] sm:$0xff]  ;;  %2721 = vmatprep.mubr.msk.f32.mxu0 %vm353_vm0, %v4459_v12  ;;  %v3059_v19 = vpack.c.bf16 %v4479_v18, %v4476_v17  ;;  %v4492_v21 = vld [vmem:[%s4424_s13 + $0x50] sm:$0xff]  ;;  %v4495_v22 = vld [vmem:[%s4424_s13 + $0x58] sm:$0xff]  ;;  %v331_v48 = vadd.s32 48, %v4583_v44  ;;  %s2244_s19 = sshll.u32 %s5403_s12, 4  ;;  %s5594_s24 = sld [smem:[#allocation30_spill]]  ;;  %s5432_s19 = int_to_ptr.vmem [resolvable:$true] %s2244_s19 }
  0x9a   : > { %3493 = vrot.lane.b32.xlu0 %v4444_v10, %s4114_s23  ;;  %3049 = vmatprep.subr.msk.bf16.mxu0 %vm4432_vm1, %v3047_v9  ;;  %v4467_v15 = vpack.i.bf16 %v301_v14, %v300_v13  ;;  %v3065_v20 = vpack.c.bf16 %v301_v14, %v300_v13  ;;  %v3071_v23 = vpack.c.bf16 %v4495_v22, %v4492_v21  ;;  %v4504_v24 = vld [vmem:[%s4424_s13 + $0x60] sm:$0xff]  ;;  %v4507_v25 = vld [vmem:[%s4424_s13 + $0x68] sm:$0xff]  ;;  %v4516_v27 = vld [vmem:[%s4424_s13 + $0x70] sm:$0xff]  ;;  %v327_v14 = vadd.s32 16, %v4583_v44  ;;  %s2229_s15 = scalar_lea.sflag [#allocation4], %s4407_s5  ;;  %s3980_s18 = scalar_lea.vmem %s5432_s19, 1024 }
  0x9b   : > { %v3077_v26 = vpack.c.bf16 %v4507_v25, %v4504_v24  ;;  %v4519_v28 = vld [vmem:[%s4424_s13 + $0x78] sm:$0xff]  ;;  %v4530_v30 = vld [vmem:[%s4413_s1 + $0x8] sm:$0xff]  ;;  %v4533_v31 = vld [vmem:[%s4413_s1 + $0x10] sm:$0xff]  ;;  %s2392_s9 = sshll.u32 %s5578_s7, 6  ;;  %s2496_s11 = sshll.u32 %s5578_s7, 4 }
  0x9c   : > { %3488 = vrot.lane.b32.xlu1 %v4450_v11, %s4114_s23  ;;  %v3083_v29 = vpack.c.bf16 %v4519_v28, %v4516_v27  ;;  %v4540_v32 = vld [vmem:[%s4413_s1 + $0x18] sm:$0xff]  ;;  %v4543_v33 = vld [vmem:[%s4413_s1 + $0x20] sm:$0xff]  ;;  %v4550_v34 = vld [vmem:[%s4413_s1 + $0x28] sm:$0xff]  ;;  %p3981_p10 = scmp.ne.s32.totalorder %s5432_s19, %s3980_s18 }
  0x9d   : > { %5575 = vst [vmem:[#allocation21_spill] sm:$0xff] %v4540_v32  ;;  %5576 = vst [vmem:[#allocation22_spill] sm:$0xff] %v4550_v34  ;;  %v4553_v35 = vld [vmem:[%s4413_s1 + $0x30] sm:$0xff]  ;;  %v4560_v36 = vld [vmem:[%s4413_s1 + $0x38] sm:$0xff]  ;;  %v4595_v49 = vstv %s2392_s9 }
  0x9e   : > { %5577 = vst [vmem:[#allocation23_spill] sm:$0xff] %v4553_v35  ;;  %5579 = vst [vmem:[#allocation24_spill] sm:$0xff] %v4560_v36  ;;  %v4568_v37 = vld [vmem:[%s4565_s28] sm:$0xff]  ;;  %v4571_v38 = vld [vmem:[%s4565_s28 + $0x8] sm:$0xff]  ;;  %v4600_v51 = vadd.s32 %v4595_v49, %v331_v48  ;;  %s2241_s4 = sadd.s32 %s5588_s27, %s2496_s11 }
  0x9f   : > { %v4574_v39 = vld [vmem:[%s4565_s28 + $0x10] sm:$0xff]  ;;  %v3089_v40 = vpack.c.bf16 %v4571_v38, %v4568_v37  ;;  %v4579_v41 = vld [vmem:[%s4565_s28 + $0x18] sm:$0xff]  ;;  %v4587_v45 = vld [vmem:[%s4565_s28 + $0x20] sm:$0xff]  ;;  %s2492_s8 = sshll.u32 %s2241_s4, 7 }
  0xa0   : > { %3503 = vrot.lane.b32.xlu1 %v4467_v15, %s4114_s23  ;;  %v3093_v42 = vpack.c.bf16 %v4579_v41, %v4574_v39  ;;  %v4590_v46 = vld [vmem:[%s4565_s28 + $0x28] sm:$0xff]  ;;  %v4603_v52 = vld [vmem:[%s4565_s28 + $0x30] sm:$0xff]  ;;  %v4606_v53 = vld [vmem:[%s4565_s28 + $0x38] sm:$0xff]  ;;  %vm351_vm2 = vcmp.le.s32.totalorder %v4597_v50, %v4600_v51  ;;  %s5441_s10 = scalar_lea.hbm %s5594_s24, %s2492_s8 }
  0xa1   : > { %3052 = vmatpush3.bf16.xpose.msk.msra.mxu0 %vm4432_vm1, %v3047_v9  ;;  %3090 = vmatprep.subr.bf16.mxu1 %v3089_v40  ;;  %v3097_v47 = vpack.c.bf16 %v4590_v46, %v4587_v45  ;;  %v3101_v54 = vpack.c.bf16 %v4606_v53, %v4603_v52  ;;  %v4613_v55 = vld [vmem:[%s4565_s28 + $0x40] sm:$0xff]  ;;  %v4616_v56 = vld [vmem:[%s4565_s28 + $0x48] sm:$0xff]  ;;  %v4619_v57 = vld [vmem:[%s4565_s28 + $0x50] sm:$0xff]  ;;  %v326_v9 = vadd.s32 8, %v4583_v44 }
  0xa2   : > { %3055 = vmatprep.subr.msk.bf16.mxu0 %vm4432_vm1, %v3053_v16  ;;  %3092 = vmatpush3.bf16.msra.mxu1 %v3089_v40  ;;  %v3105_v58 = vpack.c.bf16 %v4616_v56, %v4613_v55  ;;  %v4624_v59 = vld [vmem:[%s4565_s28 + $0x58] sm:$0xff]  ;;  %v4629_v61 = vld [vmem:[%s4565_s28 + $0x60] sm:$0xff]  ;;  %v4632_v62 = vld [vmem:[%s4565_s28 + $0x68] sm:$0xff] }
  0xa3   : > { %3094 = vmatprep.subr.bf16.mxu1 %v3093_v42  ;;  %v3109_v60 = vpack.c.bf16 %v4624_v59, %v4619_v57  ;;  %v3113_v63 = vpack.c.bf16 %v4632_v62, %v4629_v61  ;;  %v4637_v2 = vld [vmem:[%s4565_s28 + $0x70] sm:$0xff]  ;;  %v4640_v3 = vld [vmem:[%s4565_s28 + $0x78] sm:$0xff]  ;;  %v4651_v13 = vadd.s32 %v4595_v49, %v326_v9 }
  0xa4   : > { %v3117_v6 = vpack.c.bf16 %v4640_v3, %v4637_v2  ;;  %v3879_v0 = vld [vmem:[%s4565_s28 + $0x18] sm:$0xff] }
  0xa5   : > { %vm346_vm3 = vcmp.le.s32.totalorder %v4597_v50, %v4651_v13 }
  0xa6   : > { %3096 = vmatpush3.bf16.msra.mxu1 %v3093_v42 }
  0xa7   : > { %3098 = vmatprep.subr.bf16.mxu1 %v3097_v47 }
  0xa9   : > { %3058 = vmatpush3.bf16.xpose.msk.msra.mxu0 %vm4432_vm1, %v3053_v16 }
  0xaa   : > { %3061 = vmatprep.subr.msk.bf16.mxu0 %vm4432_vm1, %v3059_v19  ;;  %3100 = vmatpush3.bf16.msra.mxu1 %v3097_v47 }
  0xab   : > { %3102 = vmatprep.subr.bf16.mxu1 %v3101_v54 }
  0xae   : > { %3104 = vmatpush3.bf16.msra.mxu1 %v3101_v54  ;;  %v329_v54 = vadd.s32 32, %v4583_v44 }
  0xaf   : > { %3106 = vmatprep.subr.bf16.mxu1 %v3105_v58 }
  0xb1   : > { %3064 = vmatpush3.bf16.xpose.msk.msra.mxu0 %vm4432_vm1, %v3059_v19  ;;  %v4658_v19 = vadd.s32 %v4595_v49, %v4583_v44 }
  0xb2   : > { %3067 = vmatprep.subr.msk.bf16.mxu0 %vm4432_vm1, %v3065_v20  ;;  %3108 = vmatpush3.bf16.msra.mxu1 %v3105_v58 }
  0xb3   : > { %3110 = vmatprep.subr.bf16.mxu1 %v3109_v60  ;;  %vm345_vm4 = vcmp.le.s32.totalorder %v4597_v50, %v4658_v19 }
  0xb6   : > { %3112 = vmatpush3.bf16.msra.mxu1 %v3109_v60 }
  0xb7   : > { %3114 = vmatprep.subr.bf16.mxu1 %v3113_v63 }
  0xb9   : > { %3070 = vmatpush3.bf16.xpose.msk.msra.mxu0 %vm4432_vm1, %v3065_v20  ;;  %v330_v20 = vadd.s32 40, %v4583_v44 }
  0xba   : > { %3073 = vmatprep.subr.msk.bf16.mxu0 %vm4432_vm1, %v3071_v23  ;;  %3116 = vmatpush3.bf16.msra.mxu1 %v3113_v63 }
  0xbb   : > { %3118 = vmatprep.subr.bf16.mxu1 %v3117_v6  ;;  %v4670_v47 = vadd.s32 %v4595_v49, %v330_v20 }
  0xbd   : > { %vm350_vm6 = vcmp.le.s32.totalorder %v4597_v50, %v4670_v47 }
  0xbe   : > { %3120 = vmatpush3.bf16.msra.mxu1 %v3117_v6  ;;  %v4684_v6 = vadd.s32 %v4595_v49, %v329_v54 }
  0xc0   : > { %vm349_vm7 = vcmp.le.s32.totalorder %v4597_v50, %v4684_v6  ;;  %v3884_v6 = vld [vmem:[%s4565_s28 + $0x60] sm:$0xff] }
  0xc1   : > { %3076 = vmatpush3.bf16.xpose.msk.msra.mxu0 %vm4432_vm1, %v3071_v23 }
  0xc2   : > { %3079 = vmatprep.subr.msk.bf16.mxu0 %vm4432_vm1, %v3077_v26 }
  0xc9   : > { %3082 = vmatpush3.bf16.xpose.msk.msra.mxu0 %vm4432_vm1, %v3077_v26 }
  0xca   : > { %3085 = vmatprep.subr.msk.bf16.mxu0 %vm4432_vm1, %v3083_v29 }
  0xd1   : > { %3088 = vmatpush3.bf16.xpose.msk.msra.mxu0 %vm4432_vm1, %v3083_v29  ;;  %v4662_v29 = vadd.s32 %v4595_v49, %v327_v14 }
  0xd3   : > { %vm347_vm5 = vcmp.le.s32.totalorder %v4597_v50, %v4662_v29 }
  0xd8   : > { %2722 = vmatmul.mubr.msk.f32.vlgmr.msra.gmra.mrb[0].mxu0 %vm353_vm0, %v4530_v30 }
  0xd9   : > { %2724 = vmatprep.mubr.msk.f32.mxu0 %vm353_vm0, %v4533_v31 }
  0xdc   : > { %2725 = vmatmul.mubr.msk.f32.gmra.mrb[2].mxu0 %vm353_vm0, %v4540_v32 }
  0xdd   : > { %2727 = vmatprep.mubr.msk.f32.mxu0 %vm353_vm0, %v4543_v33 }
  0xe0   : > { %2728 = vmatmul.mubr.msk.f32.gmra.mrb[4].mxu0 %vm353_vm0, %v4550_v34 }
  0xe1   : > { %2730 = vmatprep.mubr.msk.f32.mxu0 %vm353_vm0, %v4553_v35 }
  0xe4   : > { %2731 = vmatmul.mubr.msk.f32.gmra.mrb[6].mxu0 %vm353_vm0, %v4560_v36 }
 0x10a   : > { %v3484_v1 = vpop.permute.xlu1 %3483 }
 0x10b   : > { %v3486_v4 = vunpack.i.h.bf16 %v3484_v1  ;;  %v3485_v5 = vunpack.i.l.bf16 %v3484_v1 }
 0x10d   : > { %v4644_v7 = vpack.c.bf16 %v3486_v4, %v3485_v5 }
 0x10f   : > { %3123 = vmatprep.subr.msk.bf16.mxu1 %vm4432_vm1, %v4644_v7 }
 0x1ab   : > { %v2723_v16 = vpop.f32.mrb[0].mxu0 }
 0x1ac   : > { %v532_v23 = vmul.f32 0.17677669, %v2723_v16  ;;  %v492_v26 = vpop.f32.mrb[1].mxu0 }
 0x1ad   : > { %v531_v40 = vmul.f32 0.17677669, %v492_v26  ;;  %v4702_v26 = vpack.i.bf16 %v4479_v18, %v4476_v17  ;;  %v328_v17 = vadd.s32 24, %v4583_v44  ;;  %v332_v18 = vadd.s32 56, %v4583_v44 }
 0x1ae   : > { %v540_v42 = vsel %vm346_vm3, %v532_v23, -1e+30 }
 0x1af   : > { %549 = vmax.xlane.f32.xlu0 %v540_v42  ;;  %v2726_v43 = vpop.f32.mrb[2].mxu0  ;;  %v539_v60 = vsel %vm345_vm4, %v531_v40, -1e+30  ;;  %v4708_v40 = vpack.i.bf16 %v4507_v25, %v4504_v24  ;;  %v4723_v24 = vadd.s32 %v4595_v49, %v328_v17  ;;  %v4726_v25 = vadd.s32 %v4595_v49, %v332_v18 }
 0x1b0   : > { %v502_v48 = vpop.f32.mrb[3].mxu0  ;;  %v534_v54 = vmul.f32 0.17677669, %v2726_v43 }
 0x1b1   : > { %v533_v58 = vmul.f32 0.17677669, %v502_v48  ;;  %v4714_v48 = vpack.i.bf16 %v4519_v28, %v4516_v27  ;;  %vm348_vm8 = vcmp.le.s32.totalorder %v4597_v50, %v4723_v24  ;;  %vm352_vm9 = vcmp.le.s32.totalorder %v4597_v50, %v4726_v25  ;;  %v3888_v25 = vld [vmem:[%s4565_s28 + $0x70] sm:$0xff] }
 0x1b2   : > { %v4735_v28 = vsel %vm348_vm8, %v534_v54, -1e+30 }
 0x1b3   : > { %547 = vmax.xlane.f32.xlu0 %v539_v60  ;;  %v2729_v63 = vpop.f32.mrb[4].mxu0  ;;  %v541_v1 = vsel %vm347_vm5, %v533_v58, -1e+30  ;;  %v4752_v58 = vpack.i.bf16 %v4495_v22, %v4492_v21  ;;  %v3489_v21 = vpop.permute.xlu1 %3488 }
 0x1b4   : > { %v536_v4 = vmul.f32 0.17677669, %v2729_v63  ;;  %551 = vmax.xlane.f32.xlu1 %v541_v1  ;;  %v512_v5 = vpop.f32.mrb[5].mxu0  ;;  %v3494_v22 = vpop.permute.xlu0 %3493 }
 0x1b5   : > { %v535_v14 = vmul.f32 0.17677669, %v512_v5 }
 0x1b6   : > { %v4689_v9 = vsel %vm350_vm6, %v536_v4, -1e+30 }
 0x1b7   : > { %v2732_v16 = vpop.f32.mrb[6].mxu0  ;;  %v4697_v23 = vsel %vm349_vm7, %v535_v14, -1e+30  ;;  %v3504_v4 = vpop.permute.xlu1 %3503 }
 0x1b8   : > { %557 = vmax.xlane.f32.xlu1 %v4689_v9  ;;  %v522_v20 = vpop.f32.mrb[7].mxu0  ;;  %v538_v27 = vmul.f32 0.17677669, %v2732_v16 }
 0x1b9   : > { %v537_v49 = vmul.f32 0.17677669, %v522_v20 }
 0x1ba   : > { %v4741_v44 = vsel %vm352_vm9, %v538_v27, -1e+30 }
 0x1bb   : > { %v4747_v43 = vsel %vm351_vm2, %v537_v49, -1e+30  ;;  %v3491_v49 = vunpack.i.h.bf16 %v3489_v21 }
 0x1bc   : > { %555 = vmax.xlane.f32.xlu1 %v4697_v23 }
 0x1c9   : > { %3498 = vrot.lane.b32.xlu0 %v4702_v26, %s4114_s23 }
 0x1cd   : > { %3513 = vrot.lane.b32.xlu1 %v4708_v40, %s4114_s23 }
 0x1d1   : > { %3518 = vrot.lane.b32.xlu1 %v4714_v48, %s4114_s23 }
 0x1d5   : > { %732 = vrot.lane.b32.xlu1 %v4459_v12, %s4114_s23 }
 0x1e8   : > { %553 = vmax.xlane.f32.xlu0 %v4735_v28 }
 0x1ec   : > { %561 = vmax.xlane.f32.xlu0 %v4741_v44 }
 0x1f9   : > { %559 = vmax.xlane.f32.xlu1 %v4747_v43 }
 0x202   : > { %3508 = vrot.lane.b32.xlu0 %v4752_v58, %s4114_s23 }
 0x206   : > { %738 = vrot.lane.b32.xlu0 %v4540_v32, %s4114_s23 }
 0x20a   : > { %734 = vrot.lane.b32.xlu1 %v4530_v30, %s4114_s23  ;;  %742 = vrot.lane.b32.xlu0 %v4550_v34, %s4114_s23 }
 0x20e   : > { %736 = vrot.lane.b32.xlu1 %v4533_v31, %s4114_s23  ;;  %746 = vrot.lane.b32.xlu0 %v4560_v36, %s4114_s23  ;;  %v3490_v36 = vunpack.i.l.bf16 %v3489_v21 }
 0x212   : > { %740 = vrot.lane.b32.xlu1 %v4543_v33, %s4114_s23 }
 0x216   : > { %744 = vrot.lane.b32.xlu1 %v4553_v35, %s4114_s23 }
 0x23c   : > { %v550_v63 = vpop.xlane.xlu0 %549 }
 0x23d   : > { %v564_v5 = vsub.f32 %v540_v42, %v550_v63  ;;  %v3127_v42 = vpack.c.bf16 %v3491_v49, %v3490_v36 }
 0x23f   : > { %v573_v14 = vmul.f32 1.442695, %v564_v5 }
 0x240   : > { %v548_v16 = vpop.xlane.xlu0 %547 }
 0x241   : > { %v563_v20 = vsub.f32 %v539_v60, %v548_v16  ;;  %v552_v17 = vpop.xlane.xlu1 %551  ;;  %3722 = vpow2.f32 %v573_v14  ;;  %v3496_v60 = vunpack.i.h.bf16 %v3494_v22  ;;  %v3505_v16 = vunpack.i.l.bf16 %v3504_v4 }
 0x242   : > { %v565_v18 = vsub.f32 %v541_v1, %v552_v17  ;;  %v3495_v1 = vunpack.i.l.bf16 %v3494_v22 }
 0x243   : > { %v571_v54 = vmul.f32 1.442695, %v563_v20 }
 0x244   : > { %v575_v27 = vmul.f32 1.442695, %v565_v18  ;;  %v3133_v21 = vpack.c.bf16 %v3496_v60, %v3495_v1  ;;  %v3499_v63 = vpop.permute.xlu0 %3498 }
 0x245   : > { %3724 = vpow2.f32 %v571_v54  ;;  %v3501_v36 = vunpack.i.h.bf16 %v3499_v63  ;;  %v3500_v5 = vunpack.i.l.bf16 %v3499_v63  ;;  %v558_v20 = vpop.xlane.xlu1 %557 }
 0x246   : > { %3726 = vpow2.f32 %v575_v27  ;;  %v568_v54 = vsub.f32 %v4689_v9, %v558_v20 }
 0x247   : > { %v3139_v14 = vpack.c.bf16 %v3501_v36, %v3500_v5 }
 0x248   : > { %v581_v1 = vmul.f32 1.442695, %v568_v54 }
 0x249   : > { %v556_v17 = vpop.xlane.xlu1 %555 }
 0x24a   : > { %v567_v18 = vsub.f32 %v4697_v23, %v556_v17 }
 0x24b   : > { %v4770_v34 = vpop.eup %3722 }
 0x24d   : > { %v3514_v49 = vpop.permute.xlu1 %3513 }
 0x24e   : > { %v3516_v5 = vunpack.i.h.bf16 %v3514_v49 }
 0x24f   : > { %v4772_v32 = vpop.eup %3724 }
 0x250   : > { %v4774_v35 = vpop.eup %3726  ;;  %2765 = vmatprep.mubr.f32.mxu1 %v4772_v32 }
 0x251   : > { %2766 = vmatmul.mubr.f32.vlgmr.msra.gmra.mrb[0].mxu1 %v4770_v34  ;;  %v3519_v63 = vpop.permute.xlu1 %3518 }
 0x252   : > { %3126 = vmatpush3.bf16.xpose.msk.msra.mxu1 %vm4432_vm1, %v4644_v7  ;;  %2768 = vmatprep.mubr.f32.mxu1 %v4774_v35  ;;  %v3506_v7 = vunpack.i.h.bf16 %v3504_v4  ;;  %v3520_v54 = vunpack.i.l.bf16 %v3519_v63 }
 0x253   : > { %3129 = vmatprep.subr.msk.bf16.mxu1 %vm4432_vm1, %v3127_v42 }
 0x254   : > { %v3145_v22 = vpack.c.bf16 %v3506_v7, %v3505_v16 }
 0x255   : > { %v733_v9 = vpop.permute.xlu1 %732 }
 0x25a   : > { %3132 = vmatpush3.bf16.xpose.msk.msra.mxu1 %vm4432_vm1, %v3127_v42  ;;  %v579_v42 = vmul.f32 1.442695, %v567_v18  ;;  %v3521_v18 = vunpack.i.h.bf16 %v3519_v63 }
 0x25b   : > { %3135 = vmatprep.subr.msk.bf16.mxu1 %vm4432_vm1, %v3133_v21 }
 0x262   : > { %3138 = vmatpush3.bf16.xpose.msk.msra.mxu1 %vm4432_vm1, %v3133_v21 }
 0x263   : > { %3141 = vmatprep.subr.msk.bf16.mxu1 %vm4432_vm1, %v3139_v14 }
 0x26a   : > { %3144 = vmatpush3.bf16.xpose.msk.msra.mxu1 %vm4432_vm1, %v3139_v14  ;;  %v3515_v14 = vunpack.i.l.bf16 %v3514_v49 }
 0x26b   : > { %3147 = vmatprep.subr.msk.bf16.mxu1 %vm4432_vm1, %v3145_v22 }
 0x272   : > { %3150 = vmatpush3.bf16.xpose.msk.msra.mxu1 %vm4432_vm1, %v3145_v22  ;;  %v3157_v22 = vpack.c.bf16 %v3516_v5, %v3515_v14 }
 0x275   : > { %v554_v27 = vpop.xlane.xlu0 %553 }
 0x276   : > { %v566_v4 = vsub.f32 %v4735_v28, %v554_v27 }
 0x278   : > { %v577_v60 = vmul.f32 1.442695, %v566_v4 }
 0x279   : > { %v562_v21 = vpop.xlane.xlu0 %561 }
 0x27a   : > { %3728 = vpow2.f32 %v577_v60  ;;  %v570_v20 = vsub.f32 %v4741_v44, %v562_v21  ;;  %v3163_v44 = vpack.c.bf16 %v3521_v18, %v3520_v54 }
 0x27b   : > { %3730 = vpow2.f32 %v579_v42 }
 0x27c   : > { %3732 = vpow2.f32 %v581_v1  ;;  %v585_v42 = vmul.f32 1.442695, %v570_v20 }
 0x27d   : > { %v3509_v36 = vpop.permute.xlu0 %3508 }
 0x27e   : > { %v3511_v7 = vunpack.i.h.bf16 %v3509_v36  ;;  %v3510_v16 = vunpack.i.l.bf16 %v3509_v36 }
 0x280   : > { %v3151_v23 = vpack.c.bf16 %v3511_v7, %v3510_v16 }
 0x281   : > { %v739_v36 = vpop.permute.xlu0 %738 }
 0x282   : > { %3153 = vmatprep.subr.msk.bf16.mxu1 %vm4432_vm1, %v3151_v23 }
 0x283   : > { %3156 = vmatpush3.bf16.xpose.msk.msra.mxu1 %vm4432_vm1, %v3151_v23  ;;  %v4839_v23 = vpack.i.bf16 %v4571_v38, %v4568_v37  ;;  %v4856_v37 = vpack.i.bf16 %v4606_v53, %v4603_v52  ;;  %v4862_v38 = vpack.i.bf16 %v4616_v56, %v4613_v55 }
 0x284   : > { %v4805_v28 = vpop.eup %3728  ;;  %3159 = vmatprep.subr.msk.bf16.mxu1 %vm4432_vm1, %v3157_v22 }
 0x285   : > { %v4810_v17 = vpop.eup %3730  ;;  %2769 = vmatmul.mubr.f32.gmra.mrb[2].mxu1 %v4805_v28  ;;  %v743_v14 = vpop.permute.xlu0 %742  ;;  %3523 = vrot.lane.b32.xlu1 %v4839_v23, %s4114_s23 }
 0x286   : > { %2771 = vmatprep.mubr.f32.mxu1 %v4810_v17  ;;  %v560_v27 = vpop.xlane.xlu1 %559  ;;  %v4814_v49 = vpop.eup %3732 }
 0x287   : > { %v569_v4 = vsub.f32 %v4747_v43, %v560_v27 }
 0x289   : > { %v583_v60 = vmul.f32 1.442695, %v569_v4  ;;  %2772 = vmatmul.mubr.f32.gmra.mrb[4].mxu1 %v4814_v49  ;;  %v747_v16 = vpop.permute.xlu0 %746 }
 0x28a   : > { %v735_v1 = vpop.permute.xlu1 %734 }
 0x28b   : > { %3734 = vpow2.f32 %v583_v60  ;;  %3162 = vmatpush3.bf16.xpose.msk.msra.mxu1 %vm4432_vm1, %v3157_v22  ;;  %v4843_v22 = vpack.i.bf16 %v4579_v41, %v4574_v39  ;;  %v4868_v39 = vpack.i.bf16 %v4624_v59, %v4619_v57  ;;  %v4874_v41 = vpack.i.bf16 %v4632_v62, %v4629_v61 }
 0x28c   : > { %3736 = vpow2.f32 %v585_v42  ;;  %3165 = vmatprep.subr.msk.bf16.mxu1 %vm4432_vm1, %v3163_v44 }
 0x28d   : > { %3528 = vrot.lane.b32.xlu0 %v4843_v22, %s4114_s23 }
 0x28e   : > { %v737_v63 = vpop.permute.xlu1 %736 }
 0x291   : > { %3538 = vrot.lane.b32.xlu0 %v4856_v37, %s4114_s23 }
 0x292   : > { %v741_v5 = vpop.permute.xlu1 %740 }
 0x293   : > { %3168 = vmatpush3.bf16.xpose.msk.msra.mxu1 %vm4432_vm1, %v3163_v44 }
 0x295   : > { %v4824_v21 = vpop.eup %3734  ;;  %3548 = vrot.lane.b32.xlu0 %v4868_v39, %s4114_s23 }
 0x296   : > { %v4826_v43 = vpop.eup %3736  ;;  %2774 = vmatprep.mubr.f32.mxu1 %v4824_v21  ;;  %v745_v7 = vpop.permute.xlu1 %744 }
 0x297   : > { %2775 = vmatmul.mubr.f32.gmra.mrb[6].mxu1 %v4826_v43 }
 0x298   : > { %2809 = vmatprep.mubr.msk.f32.mxu1 %vm353_vm0, %v733_v9  ;;  %v4850_v9 = vpack.i.bf16 %v4590_v46, %v4587_v45  ;;  %v4880_v45 = vpack.i.bf16 %v4640_v3, %v4637_v2 }
 0x29a   : > { %3533 = vrot.lane.b32.xlu1 %v4850_v9, %s4114_s23  ;;  %3558 = vrot.lane.b32.xlu0 %v4880_v45, %s4114_s23 }
 0x29b   : > { %2810 = vmatmul.mubr.msk.f32.vlgmr.msra.gmra.mrb[8].mxu1 %vm353_vm0, %v735_v1 }
 0x29c   : > { %2812 = vmatprep.mubr.msk.f32.mxu1 %vm353_vm0, %v737_v63 }
 0x29e   : > { %3543 = vrot.lane.b32.xlu1 %v4862_v38, %s4114_s23 }
 0x29f   : > { %2813 = vmatmul.mubr.msk.f32.gmra.mrb[10].mxu1 %vm353_vm0, %v739_v36 }
 0x2a0   : > { %2815 = vmatprep.mubr.msk.f32.mxu1 %vm353_vm0, %v741_v5 }
 0x2a2   : > { %3553 = vrot.lane.b32.xlu1 %v4874_v41, %s4114_s23 }
 0x2a3   : > { %2816 = vmatmul.mubr.msk.f32.gmra.mrb[12].mxu1 %vm353_vm0, %v743_v14 }
 0x2a4   : > { %2818 = vmatprep.mubr.msk.f32.mxu1 %vm353_vm0, %v745_v7 }
 0x2a6   : > { %3563 = vrot.lane.b32.xlu1 %v4442_v8, %s4115_s3 }
 0x2a7   : > { %2819 = vmatmul.mubr.msk.f32.gmra.mrb[14].mxu1 %vm353_vm0, %v747_v16 }
 0x2f7   : > { %v3524_v53 = vpop.permute.xlu1 %3523 }
 0x2f8   : > { %v3526_v55 = vunpack.i.h.bf16 %v3524_v53  ;;  %v3525_v56 = vunpack.i.l.bf16 %v3524_v53 }
 0x2fa   : > { %v3169_v59 = vpack.c.bf16 %v3526_v55, %v3525_v56 }
 0x2fc   : > { %3170 = vmatprep.subr.bf16.mxu0 %v3169_v59 }
 0x2fd   : > { %3172 = vmatpush3.bf16.msra.mxu0 %v3169_v59 }
 0x2ff   : > { %v3529_v57 = vpop.permute.xlu0 %3528 }
 0x300   : > { %v3531_v61 = vunpack.i.h.bf16 %v3529_v57  ;;  %v3530_v62 = vunpack.i.l.bf16 %v3529_v57 }
 0x302   : > { %v3173_v3 = vpack.c.bf16 %v3531_v61, %v3530_v62 }
 0x303   : > { %v3539_v8 = vpop.permute.xlu0 %3538 }
 0x304   : > { %3174 = vmatprep.subr.bf16.mxu0 %v3173_v3  ;;  %v3541_v27 = vunpack.i.h.bf16 %v3539_v8  ;;  %v3540_v4 = vunpack.i.l.bf16 %v3539_v8 }
 0x305   : > { %3176 = vmatpush3.bf16.msra.mxu0 %v3173_v3 }
 0x306   : > { %v3181_v60 = vpack.c.bf16 %v3541_v27, %v3540_v4 }
 0x307   : > { %v3549_v44 = vpop.permute.xlu0 %3548 }
 0x308   : > { %v3551_v36 = vunpack.i.h.bf16 %v3549_v44  ;;  %v3550_v5 = vunpack.i.l.bf16 %v3549_v44 }
 0x30a   : > { %v3189_v16 = vpack.c.bf16 %v3551_v36, %v3550_v5 }
 0x30c   : > { %v3534_v2 = vpop.permute.xlu1 %3533  ;;  %v3559_v56 = vpop.permute.xlu0 %3558 }
 0x30d   : > { %v3536_v20 = vunpack.i.h.bf16 %v3534_v2  ;;  %v3535_v18 = vunpack.i.l.bf16 %v3534_v2  ;;  %v3561_v57 = vunpack.i.h.bf16 %v3559_v56  ;;  %v3560_v59 = vunpack.i.l.bf16 %v3559_v56 }
 0x30f   : > { %v3177_v54 = vpack.c.bf16 %v3536_v20, %v3535_v18  ;;  %v3197_v2 = vpack.c.bf16 %v3561_v57, %v3560_v59 }
 0x310   : > { %v3544_v42 = vpop.permute.xlu1 %3543 }
 0x311   : > { %3178 = vmatprep.subr.bf16.mxu0 %v3177_v54  ;;  %v3546_v1 = vunpack.i.h.bf16 %v3544_v42  ;;  %v3545_v63 = vunpack.i.l.bf16 %v3544_v42 }
 0x312   : > { %3180 = vmatpush3.bf16.msra.mxu0 %v3177_v54 }
 0x313   : > { %3182 = vmatprep.subr.bf16.mxu0 %v3181_v60  ;;  %v3185_v14 = vpack.c.bf16 %v3546_v1, %v3545_v63 }
 0x314   : > { %v3554_v7 = vpop.permute.xlu1 %3553 }
 0x315   : > { %v3556_v53 = vunpack.i.h.bf16 %v3554_v7  ;;  %v3555_v55 = vunpack.i.l.bf16 %v3554_v7 }
 0x316   : > { %3184 = vmatpush3.bf16.msra.mxu0 %v3181_v60 }
 0x317   : > { %3186 = vmatprep.subr.bf16.mxu0 %v3185_v14  ;;  %v3193_v61 = vpack.c.bf16 %v3556_v53, %v3555_v55 }
 0x318   : > { %v3564_v62 = vpop.permute.xlu1 %3563 }
 0x319   : > { %v3566_v3 = vunpack.i.h.bf16 %v3564_v62  ;;  %v3565_v20 = vunpack.i.l.bf16 %v3564_v62 }
 0x31a   : > { %3188 = vmatpush3.bf16.msra.mxu0 %v3185_v14 }
 0x31b   : > { %3190 = vmatprep.subr.bf16.mxu0 %v3189_v16  ;;  %v4892_v18 = vpack.c.bf16 %v3566_v3, %v3565_v20 }
 0x31e   : > { %3192 = vmatpush3.bf16.msra.mxu0 %v3189_v16 }
 0x31f   : > { %3194 = vmatprep.subr.bf16.mxu0 %v3193_v61 }
 0x322   : > { %3196 = vmatpush3.bf16.msra.mxu0 %v3193_v61 }
 0x323   : > { %3198 = vmatprep.subr.bf16.mxu0 %v3197_v2 }
 0x324   : > { %v4888_v46 = vpop.f32.mrb[0].mxu1 }
 0x325   : > { %v4890_v52 = vpop.f32.mrb[1].mxu1 }
 0x326   : > { %3200 = vmatpush3.bf16.msra.mxu0 %v3197_v2 }
 0x327   : > { %3203 = vmatprep.subr.msk.bf16.mxu0 %vm4432_vm1, %v4892_v18 }
 0x358   : > { %v4897_v8 = vpop.f32.mrb[2].mxu1 }
 0x359   : > { %v4899_v54 = vpop.f32.mrb[3].mxu1 }
 0x35c   : > { %v4901_v27 = vpop.f32.mrb[4].mxu1 }
 0x35d   : > { %5580 = vst [vmem:[#allocation25_spill] sm:$0xff] %v4901_v27  ;;  %v4903_v4 = vpop.f32.mrb[5].mxu1 }
 0x35e   : > { %5581 = vst [vmem:[#allocation26_spill] sm:$0xff] %v4903_v4 }
 0x36a   : > { %v4905_v42 = vpop.f32.mrb[6].mxu1 }
 0x36b   : > { %5582 = vst [vmem:[#allocation27_spill] sm:$0xff] %v4905_v42  ;;  %v4907_v60 = vpop.f32.mrb[7].mxu1 }
 0x36c   : > { %5583 = vst [vmem:[#allocation28_spill] sm:$0xff] %v4907_v60 }
 0x36e   : > { %v2811_v44 = vpop.f32.mrb[8].mxu1 }
 0x36f   : > { %v934_v1 = vmul.f32 0.17677669, %v2811_v44  ;;  %v894_v63 = vpop.f32.mrb[9].mxu1 }
 0x370   : > { %v933_v36 = vmul.f32 0.17677669, %v894_v63 }
 0x371   : > { %v942_v5 = vsel %vm346_vm3, %v934_v1, -1e+30 }
 0x372   : > { %951 = vmax.xlane.f32.xlu1 %v942_v5  ;;  %v941_v14 = vsel %vm345_vm4, %v933_v36, -1e+30  ;;  %v2814_v7 = vpop.f32.mrb[10].mxu1 }
 0x373   : > { %949 = vmax.xlane.f32.xlu0 %v941_v14  ;;  %v904_v16 = vpop.f32.mrb[11].mxu1 }
 0x374   : > { %v935_v59 = vmul.f32 0.17677669, %v904_v16 }
 0x376   : > { %v2817_v53 = vpop.f32.mrb[12].mxu1  ;;  %v4926_v62 = vsel %vm347_vm5, %v935_v59, -1e+30 }
 0x377   : > { %v914_v55 = vpop.f32.mrb[13].mxu1  ;;  %v938_v61 = vmul.f32 0.17677669, %v2817_v53 }
 0x378   : > { %v937_v2 = vmul.f32 0.17677669, %v914_v55 }
 0x37a   : > { %v2820_v56 = vpop.f32.mrb[14].mxu1  ;;  %v4944_v3 = vsel %vm349_vm7, %v937_v2, -1e+30 }
 0x37b   : > { %v924_v57 = vpop.f32.mrb[15].mxu1 }
 0x37c   : > { %v939_v44 = vmul.f32 0.17677669, %v924_v57 }
 0x37e   : > { %v4956_v1 = vsel %vm351_vm2, %v939_v44, -1e+30 }
 0x383   : > { %3573 = vrot.lane.b32.xlu1 %v4444_v10, %s4115_s3  ;;  %v4932_v10 = vsel %vm350_vm6, %v938_v61, -1e+30 }
 0x387   : > { %3578 = vrot.lane.b32.xlu1 %v4702_v26, %s4115_s3  ;;  %v936_v26 = vmul.f32 0.17677669, %v2814_v7 }
 0x389   : > { %3568 = vrot.lane.b32.xlu0 %v4450_v11, %s4115_s3  ;;  %v940_v11 = vmul.f32 0.17677669, %v2820_v56 }
 0x38b   : > { %3583 = vrot.lane.b32.xlu1 %v4467_v15, %s4115_s3  ;;  %v4938_v15 = vsel %vm348_vm8, %v936_v26, -1e+30  ;;  %v4950_v20 = vsel %vm352_vm9, %v940_v11, -1e+30 }
 0x3a8   : > { %953 = vmax.xlane.f32.xlu0 %v4926_v62 }
 0x3ac   : > { %959 = vmax.xlane.f32.xlu0 %v4932_v10 }
 0x3af   : > { %955 = vmax.xlane.f32.xlu1 %v4938_v15 }
 0x3b0   : > { %957 = vmax.xlane.f32.xlu0 %v4944_v3 }
 0x3b4   : > { %963 = vmax.xlane.f32.xlu0 %v4950_v20 }
 0x3b8   : > { %961 = vmax.xlane.f32.xlu0 %v4956_v1 }
 0x3c0   : > { %3593 = vrot.lane.b32.xlu1 %v4708_v40, %s4115_s3  ;;  %v5584_v40 = vld [vmem:[#allocation23_spill] sm:$0xff] }
 0x3c4   : > { %3598 = vrot.lane.b32.xlu1 %v4714_v48, %s4115_s3  ;;  %v5585_v48 = vld [vmem:[#allocation21_spill] sm:$0xff] }
 0x3c8   : > { %1198 = vrot.lane.b32.xlu1 %v4459_v12, %s4115_s3  ;;  %v5586_v12 = vld [vmem:[#allocation22_spill] sm:$0xff] }
 0x3cc   : > { %1202 = vrot.lane.b32.xlu1 %v4533_v31, %s4115_s3  ;;  %v5587_v31 = vld [vmem:[#allocation24_spill] sm:$0xff] }
 0x3ce   : > { %3588 = vrot.lane.b32.xlu0 %v4752_v58, %s4115_s3 }
 0x3d0   : > { %1206 = vrot.lane.b32.xlu1 %v4543_v33, %s4115_s3 }
 0x3d2   : > { %1200 = vrot.lane.b32.xlu0 %v4530_v30, %s4115_s3 }
 0x3d4   : > { %1210 = vrot.lane.b32.xlu1 %v5584_v40, %s4115_s3 }
 0x3d6   : > { %1204 = vrot.lane.b32.xlu0 %v5585_v48, %s4115_s3 }
 0x3d8   : > { %3603 = vrot.lane.b32.xlu1 %v4839_v23, %s4115_s3 }
 0x3da   : > { %1208 = vrot.lane.b32.xlu0 %v5586_v12, %s4115_s3 }
 0x3dc   : > { %3613 = vrot.lane.b32.xlu1 %v4850_v9, %s4115_s3  ;;  %v3851_v9 = vld [vmem:[%s4424_s13 + $0x8] sm:$0xff] }
 0x3de   : > { %1212 = vrot.lane.b32.xlu0 %v5587_v31, %s4115_s3 }
 0x3e0   : > { %3623 = vrot.lane.b32.xlu1 %v4862_v38, %s4115_s3 }
 0x3e2   : > { %3608 = vrot.lane.b32.xlu0 %v4843_v22, %s4115_s3  ;;  %v3850_v22 = vld [vmem:[%s4424_s13] sm:$0xff] }
 0x3e4   : > { %3633 = vrot.lane.b32.xlu1 %v4874_v41, %s4115_s3 }
 0x3e6   : > { %3618 = vrot.lane.b32.xlu0 %v4856_v37, %s4115_s3 }
 0x3ea   : > { %3628 = vrot.lane.b32.xlu0 %v4868_v39, %s4115_s3 }
 0x3ee   : > { %3638 = vrot.lane.b32.xlu0 %v4880_v45, %s4115_s3 }
 0x3ff   : > { %v952_v63 = vpop.xlane.xlu1 %951 }
 0x400   : > { %v966_v58 = vsub.f32 %v942_v5, %v952_v63  ;;  %v950_v36 = vpop.xlane.xlu0 %949 }
 0x401   : > { %v965_v7 = vsub.f32 %v941_v14, %v950_v36 }
 0x402   : > { %v975_v33 = vmul.f32 1.442695, %v966_v58 }
 0x403   : > { %v973_v16 = vmul.f32 1.442695, %v965_v7  ;;  %v3574_v61 = vpop.permute.xlu1 %3573 }
 0x404   : > { %v3569_v30 = vpop.permute.xlu0 %3568  ;;  %v3576_v5 = vunpack.i.h.bf16 %v3574_v61  ;;  %v3575_v14 = vunpack.i.l.bf16 %v3574_v61 }
 0x405   : > { %3738 = vpow2.f32 %v973_v16  ;;  %v3571_v53 = vunpack.i.h.bf16 %v3569_v30  ;;  %v3570_v55 = vunpack.i.l.bf16 %v3569_v30 }
 0x406   : > { %3740 = vpow2.f32 %v975_v33  ;;  %v3213_v26 = vpack.c.bf16 %v3576_v5, %v3575_v14 }
 0x407   : > { %v3207_v59 = vpack.c.bf16 %v3571_v53, %v3570_v55  ;;  %v3579_v2 = vpop.permute.xlu1 %3578 }
 0x408   : > { %v3581_v11 = vunpack.i.h.bf16 %v3579_v2  ;;  %v3580_v44 = vunpack.i.l.bf16 %v3579_v2 }
 0x40a   : > { %v3219_v40 = vpack.c.bf16 %v3581_v11, %v3580_v44 }
 0x40b   : > { %v3584_v48 = vpop.permute.xlu1 %3583 }
 0x40c   : > { %v3585_v12 = vunpack.i.l.bf16 %v3584_v48 }
 0x40f   : > { %v4981_v56 = vpop.eup %3738 }
 0x410   : > { %v4983_v57 = vpop.eup %3740  ;;  %2853 = vmatprep.mubr.f32.mxu0 %v4981_v56 }
 0x411   : > { %2854 = vmatmul.mubr.f32.vlgmr.msra.gmra.mrb[8].mxu0 %v4983_v57 }
 0x412   : > { %3206 = vmatpush3.bf16.xpose.msk.msra.mxu0 %vm4432_vm1, %v4892_v18  ;;  %v3586_v18 = vunpack.i.h.bf16 %v3584_v48 }
 0x413   : > { %3209 = vmatprep.subr.msk.bf16.mxu0 %vm4432_vm1, %v3207_v59 }
 0x414   : > { %v3225_v31 = vpack.c.bf16 %v3586_v18, %v3585_v12 }
 0x41a   : > { %3212 = vmatpush3.bf16.xpose.msk.msra.mxu0 %vm4432_vm1, %v3207_v59 }
 0x41b   : > { %3215 = vmatprep.subr.msk.bf16.mxu0 %vm4432_vm1, %v3213_v26 }
 0x422   : > { %3218 = vmatpush3.bf16.xpose.msk.msra.mxu0 %vm4432_vm1, %v3213_v26 }
 0x423   : > { %3221 = vmatprep.subr.msk.bf16.mxu0 %vm4432_vm1, %v3219_v40 }
 0x42a   : > { %3224 = vmatpush3.bf16.xpose.msk.msra.mxu0 %vm4432_vm1, %v3219_v40 }
 0x42b   : > { %3227 = vmatprep.subr.msk.bf16.mxu0 %vm4432_vm1, %v3225_v31 }
 0x432   : > { %3230 = vmatpush3.bf16.xpose.msk.msra.mxu0 %vm4432_vm1, %v3225_v31 }
 0x435   : > { %v954_v63 = vpop.xlane.xlu0 %953 }
 0x436   : > { %v967_v58 = vsub.f32 %v4926_v62, %v954_v63 }
 0x438   : > { %v977_v36 = vmul.f32 1.442695, %v967_v58 }
 0x439   : > { %v960_v7 = vpop.xlane.xlu0 %959 }
 0x43a   : > { %3742 = vpow2.f32 %v977_v36  ;;  %v970_v16 = vsub.f32 %v4932_v10, %v960_v7 }
 0x43c   : > { %v956_v33 = vpop.xlane.xlu1 %955  ;;  %v983_v5 = vmul.f32 1.442695, %v970_v16 }
 0x43d   : > { %v968_v30 = vsub.f32 %v4938_v15, %v956_v33  ;;  %v958_v53 = vpop.xlane.xlu0 %957 }
 0x43e   : > { %v969_v55 = vsub.f32 %v4944_v3, %v958_v53 }
 0x43f   : > { %v979_v59 = vmul.f32 1.442695, %v968_v30 }
 0x440   : > { %v981_v61 = vmul.f32 1.442695, %v969_v55  ;;  %v3594_v10 = vpop.permute.xlu1 %3593 }
 0x441   : > { %3744 = vpow2.f32 %v979_v59  ;;  %v964_v14 = vpop.xlane.xlu0 %963  ;;  %v3596_v3 = vunpack.i.h.bf16 %v3594_v10  ;;  %v3595_v40 = vunpack.i.l.bf16 %v3594_v10  ;;  %v3642_v10 = vpack.i.bf16 %v3851_v9, %v3850_v22 }
 0x442   : > { %3746 = vpow2.f32 %v981_v61  ;;  %v972_v26 = vsub.f32 %v4950_v20, %v964_v14 }
 0x443   : > { %3748 = vpow2.f32 %v983_v5  ;;  %v3237_v58 = vpack.c.bf16 %v3596_v3, %v3595_v40  ;;  %3643 = vrot.lane.b32.xlu1 %v3642_v10, %s4116_s29 }
 0x444   : > { %v5011_v62 = vpop.eup %3742  ;;  %v987_v11 = vmul.f32 1.442695, %v972_v26 }
 0x445   : > { %v962_v2 = vpop.xlane.xlu0 %961  ;;  %2856 = vmatprep.mubr.f32.mxu0 %v5011_v62 }
 0x446   : > { %v971_v15 = vsub.f32 %v4956_v1, %v962_v2  ;;  %v3599_v1 = vpop.permute.xlu1 %3598 }
 0x447   : > { %v3601_v7 = vunpack.i.h.bf16 %v3599_v1  ;;  %v3600_v33 = vunpack.i.l.bf16 %v3599_v1 }
 0x448   : > { %v985_v44 = vmul.f32 1.442695, %v971_v15 }
 0x449   : > { %v3589_v48 = vpop.permute.xlu0 %3588  ;;  %v3243_v30 = vpack.c.bf16 %v3601_v7, %v3600_v33 }
 0x44a   : > { %3750 = vpow2.f32 %v985_v44  ;;  %v3591_v18 = vunpack.i.h.bf16 %v3589_v48  ;;  %v3590_v12 = vunpack.i.l.bf16 %v3589_v48  ;;  %v1199_v53 = vpop.permute.xlu1 %1198 }
 0x44b   : > { %v5015_v31 = vpop.eup %3744  ;;  %3752 = vpow2.f32 %v987_v11 }
 0x44c   : > { %v5017_v20 = vpop.eup %3746  ;;  %v3231_v63 = vpack.c.bf16 %v3591_v18, %v3590_v12  ;;  %2857 = vmatmul.mubr.f32.gmra.mrb[10].mxu0 %v5015_v31 }
 0x44d   : > { %2859 = vmatprep.mubr.f32.mxu0 %v5017_v20  ;;  %v5023_v36 = vpop.eup %3748  ;;  %v1201_v59 = vpop.permute.xlu0 %1200 }
 0x44e   : > { %3233 = vmatprep.subr.msk.bf16.mxu0 %vm4432_vm1, %v3231_v63  ;;  %v1203_v61 = vpop.permute.xlu1 %1202 }
 0x44f   : > { %3236 = vmatpush3.bf16.xpose.msk.msra.mxu0 %vm4432_vm1, %v3231_v63 }
 0x450   : > { %2860 = vmatmul.mubr.f32.gmra.mrb[12].mxu0 %v5023_v36  ;;  %3239 = vmatprep.subr.msk.bf16.mxu0 %vm4432_vm1, %v3237_v58 }
 0x451   : > { %v1205_v5 = vpop.permute.xlu0 %1204 }
 0x452   : > { %v1207_v14 = vpop.permute.xlu1 %1206 }
 0x454   : > { %v5030_v16 = vpop.eup %3750 }
 0x455   : > { %v5032_v55 = vpop.eup %3752  ;;  %2862 = vmatprep.mubr.f32.mxu0 %v5030_v16  ;;  %v1209_v26 = vpop.permute.xlu0 %1208 }
 0x456   : > { %2863 = vmatmul.mubr.f32.gmra.mrb[14].mxu0 %v5032_v55  ;;  %v1211_v2 = vpop.permute.xlu1 %1210 }
 0x457   : > { %3242 = vmatpush3.bf16.xpose.msk.msra.mxu0 %vm4432_vm1, %v3237_v58  ;;  %2897 = vmatprep.mubr.msk.f32.mxu0 %vm353_vm0, %v1199_v53 }
 0x458   : > { %3245 = vmatprep.subr.msk.bf16.mxu0 %vm4432_vm1, %v3243_v30 }
 0x459   : > { %v1213_v23 = vpop.permute.xlu0 %1212 }
 0x45a   : > { %v3604_v15 = vpop.permute.xlu1 %3603 }
 0x45b   : > { %v3606_v39 = vunpack.i.h.bf16 %v3604_v15  ;;  %v3605_v11 = vunpack.i.l.bf16 %v3604_v15 }
 0x45d   : > { %v3609_v44 = vpop.permute.xlu0 %3608  ;;  %v3249_v3 = vpack.c.bf16 %v3606_v39, %v3605_v11 }
 0x45e   : > { %v3611_v40 = vunpack.i.h.bf16 %v3609_v44  ;;  %v3610_v41 = vunpack.i.l.bf16 %v3609_v44  ;;  %v3614_v48 = vpop.permute.xlu1 %3613 }
 0x45f   : > { %3248 = vmatpush3.bf16.xpose.msk.msra.mxu0 %vm4432_vm1, %v3243_v30  ;;  %3250 = vmatprep.subr.bf16.mxu1 %v3249_v3  ;;  %v3616_v12 = vunpack.i.h.bf16 %v3614_v48  ;;  %v3615_v45 = vunpack.i.l.bf16 %v3614_v48 }
 0x460   : > { %3252 = vmatpush3.bf16.msra.mxu1 %v3249_v3  ;;  %v3253_v18 = vpack.c.bf16 %v3611_v40, %v3610_v41 }
 0x461   : > { %v3619_v63 = vpop.permute.xlu0 %3618  ;;  %v3257_v58 = vpack.c.bf16 %v3616_v12, %v3615_v45 }
 0x462   : > { %3254 = vmatprep.subr.bf16.mxu1 %v3253_v18  ;;  %v3621_v1 = vunpack.i.h.bf16 %v3619_v63  ;;  %v3620_v7 = vunpack.i.l.bf16 %v3619_v63  ;;  %v3624_v33 = vpop.permute.xlu1 %3623 }
 0x464   : > { %3256 = vmatpush3.bf16.msra.mxu1 %v3253_v18  ;;  %v3261_v30 = vpack.c.bf16 %v3621_v1, %v3620_v7 }
 0x465   : > { %3258 = vmatprep.subr.bf16.mxu1 %v3257_v58  ;;  %v3629_v53 = vpop.permute.xlu0 %3628 }
 0x466   : > { %2898 = vmatmul.mubr.msk.f32.vlgmr.msra.gmra.mrb[16].mxu0 %vm353_vm0, %v1201_v59  ;;  %v3626_v59 = vunpack.i.h.bf16 %v3624_v33 }
 0x467   : > { %2900 = vmatprep.mubr.msk.f32.mxu0 %vm353_vm0, %v1203_v61  ;;  %v3625_v61 = vunpack.i.l.bf16 %v3624_v33 }
 0x468   : > { %3260 = vmatpush3.bf16.msra.mxu1 %v3257_v58 }
 0x469   : > { %3262 = vmatprep.subr.bf16.mxu1 %v3261_v30  ;;  %v3639_v10 = vpop.permute.xlu0 %3638 }
 0x46a   : > { %2901 = vmatmul.mubr.msk.f32.gmra.mrb[18].mxu0 %vm353_vm0, %v1205_v5  ;;  %v3631_v5 = vunpack.i.h.bf16 %v3629_v53  ;;  %v3641_v39 = vunpack.i.h.bf16 %v3639_v10  ;;  %v3640_v11 = vunpack.i.l.bf16 %v3639_v10  ;;  %v3853_v10 = vld [vmem:[%s4424_s13 + $0x28] sm:$0xff] }
 0x46b   : > { %2903 = vmatprep.mubr.msk.f32.mxu0 %vm353_vm0, %v1207_v14  ;;  %v3630_v14 = vunpack.i.l.bf16 %v3629_v53 }
 0x46c   : > { %3264 = vmatpush3.bf16.msra.mxu1 %v3261_v30  ;;  %v3277_v3 = vpack.c.bf16 %v3641_v39, %v3640_v11  ;;  %v3854_v39 = vld [vmem:[%s4424_s13 + $0x30] sm:$0xff]  ;;  %v3855_v11 = vld [vmem:[%s4424_s13 + $0x38] sm:$0xff] }
 0x46e   : > { %2904 = vmatmul.mubr.msk.f32.gmra.mrb[20].mxu0 %vm353_vm0, %v1209_v26  ;;  %v3265_v26 = vpack.c.bf16 %v3626_v59, %v3625_v61 }
 0x46f   : > { %2906 = vmatprep.mubr.msk.f32.mxu0 %vm353_vm0, %v1211_v2  ;;  %v3634_v2 = vpop.permute.xlu1 %3633 }
 0x470   : > { %3266 = vmatprep.subr.bf16.mxu1 %v3265_v26  ;;  %v3636_v22 = vunpack.i.h.bf16 %v3634_v2  ;;  %v3635_v9 = vunpack.i.l.bf16 %v3634_v2 }
 0x471   : > { %3268 = vmatpush3.bf16.msra.mxu1 %v3265_v26 }
 0x472   : > { %2907 = vmatmul.mubr.msk.f32.gmra.mrb[22].mxu0 %vm353_vm0, %v1213_v23  ;;  %v3269_v23 = vpack.c.bf16 %v3631_v5, %v3630_v14  ;;  %v3273_v15 = vpack.c.bf16 %v3636_v22, %v3635_v9  ;;  %v3852_v9 = vld [vmem:[%s4424_s13 + $0x20] sm:$0xff] }
 0x474   : > { %3270 = vmatprep.subr.bf16.mxu1 %v3269_v23 }
 0x475   : > { %3272 = vmatpush3.bf16.msra.mxu1 %v3269_v23 }
 0x476   : > { %3274 = vmatprep.subr.bf16.mxu1 %v3273_v15 }
 0x479   : > { %3276 = vmatpush3.bf16.msra.mxu1 %v3273_v15  ;;  %v3652_v15 = vpack.i.bf16 %v3853_v10, %v3852_v9 }
 0x47a   : > { %3278 = vmatprep.subr.bf16.mxu1 %v3277_v3 }
 0x47d   : > { %3280 = vmatpush3.bf16.msra.mxu1 %v3277_v3  ;;  %v3856_v3 = vld [vmem:[%s4424_s13 + $0x10] sm:$0xff] }
 0x4b5   : > { %v3644_v44 = vpop.permute.xlu1 %3643 }
 0x4b6   : > { %v3646_v40 = vunpack.i.h.bf16 %v3644_v44  ;;  %v3645_v41 = vunpack.i.l.bf16 %v3644_v44  ;;  %v3657_v44 = vpack.i.bf16 %v3855_v11, %v3854_v39  ;;  %v3860_v11 = vld [vmem:[%s4424_s13 + $0x60] sm:$0xff] }
 0x4b8   : > { %v5073_v48 = vpack.c.bf16 %v3646_v40, %v3645_v41  ;;  %v3857_v40 = vld [vmem:[%s4424_s13 + $0x18] sm:$0xff] }
 0x4b9   : > { %v3647_v41 = vpack.i.bf16 %v3857_v40, %v3856_v3  ;;  %v3862_v40 = vld [vmem:[%s4424_s13 + $0x70] sm:$0xff] }
 0x4ba   : > { %3283 = vmatprep.subr.msk.bf16.mxu1 %vm4432_vm1, %v5073_v48 }
 0x4e4   : > { %v5069_v37 = vpop.f32.mrb[8].mxu0 }
 0x4e5   : > { %v5071_v38 = vpop.f32.mrb[9].mxu0 }
 0x51f   : > { %v5078_v18 = vpop.f32.mrb[10].mxu0 }
 0x520   : > { %v5080_v12 = vpop.f32.mrb[11].mxu0 }
 0x523   : > { %v5082_v45 = vpop.f32.mrb[12].mxu0 }
 0x524   : > { %v5084_v63 = vpop.f32.mrb[13].mxu0 }
 0x529   : > { %v5086_v58 = vpop.f32.mrb[14].mxu0 }
 0x52a   : > { %v5088_v1 = vpop.f32.mrb[15].mxu0 }
 0x539   : > { %v2899_v7 = vpop.f32.mrb[16].mxu0 }
 0x53a   : > { %v1400_v33 = vmul.f32 0.17677669, %v2899_v7  ;;  %v1360_v30 = vpop.f32.mrb[17].mxu0  ;;  %v3858_v7 = vld [vmem:[%s4424_s13 + $0x40] sm:$0xff] }
 0x53b   : > { %v1399_v53 = vmul.f32 0.17677669, %v1360_v30 }
 0x53c   : > { %v5093_v59 = vsel %vm346_vm3, %v1400_v33, -1e+30  ;;  %v3859_v33 = vld [vmem:[%s4424_s13 + $0x48] sm:$0xff] }
 0x53d   : > { %1417 = vmax.xlane.f32.xlu1 %v5093_v59  ;;  %v5099_v61 = vsel %vm345_vm4, %v1399_v53, -1e+30  ;;  %v2902_v5 = vpop.f32.mrb[18].mxu0  ;;  %v3662_v30 = vpack.i.bf16 %v3859_v33, %v3858_v7  ;;  %v3864_v7 = vld [vmem:[%s4413_s1] sm:$0xff]  ;;  %v3865_v33 = vld [vmem:[%s4424_s13 + $0x50] sm:$0xff] }
 0x53e   : > { %1415 = vmax.xlane.f32.xlu0 %v5099_v61  ;;  %v1370_v14 = vpop.f32.mrb[19].mxu0 }
 0x53f   : > { %v1401_v53 = vmul.f32 0.17677669, %v1370_v14 }
 0x541   : > { %v2905_v26 = vpop.f32.mrb[20].mxu0  ;;  %v5117_v9 = vsel %vm347_vm5, %v1401_v53, -1e+30 }
 0x542   : > { %v1380_v2 = vpop.f32.mrb[21].mxu0  ;;  %v1404_v60 = vmul.f32 0.17677669, %v2905_v26 }
 0x543   : > { %v1403_v39 = vmul.f32 0.17677669, %v1380_v2 }
 0x544   : > { %v5123_v10 = vsel %vm350_vm6, %v1404_v60, -1e+30 }
 0x545   : > { %v2908_v23 = vpop.f32.mrb[22].mxu0  ;;  %v5135_v60 = vsel %vm349_vm7, %v1403_v39, -1e+30  ;;  %v3868_v39 = vld [vmem:[%s4413_s1 + $0x20] sm:$0xff] }
 0x546   : > { %v1390_v22 = vpop.f32.mrb[23].mxu0  ;;  %v1406_v14 = vmul.f32 0.17677669, %v2908_v23 }
 0x547   : > { %v1405_v2 = vmul.f32 0.17677669, %v1390_v22  ;;  %v3863_v22 = vld [vmem:[%s4424_s13 + $0x78] sm:$0xff] }
 0x549   : > { %v5147_v23 = vsel %vm351_vm2, %v1405_v2, -1e+30  ;;  %v3870_v2 = vld [vmem:[%s4413_s1 + $0x30] sm:$0xff] }
 0x54e   : > { %3653 = vrot.lane.b32.xlu1 %v3652_v15, %s4116_s29  ;;  %v1402_v15 = vmul.f32 0.17677669, %v2902_v5  ;;  %v5141_v5 = vsel %vm352_vm9, %v1406_v14, -1e+30  ;;  %v3869_v14 = vld [vmem:[%s4413_s1 + $0x8] sm:$0xff] }
 0x550   : > { %v5129_v26 = vsel %vm348_vm8, %v1402_v15, -1e+30  ;;  %v3867_v15 = vld [vmem:[%s4413_s1 + $0x10] sm:$0xff] }
 0x552   : > { %3658 = vrot.lane.b32.xlu1 %v3657_v44, %s4116_s29  ;;  %v3861_v44 = vld [vmem:[%s4424_s13 + $0x68] sm:$0xff] }
 0x553   : > { %v3672_v3 = vpack.i.bf16 %v3861_v44, %v3860_v11  ;;  %v3871_v11 = vld [vmem:[%s4413_s1 + $0x18] sm:$0xff]  ;;  %v3872_v44 = vld [vmem:[%s4413_s1 + $0x28] sm:$0xff] }
 0x554   : > { %3648 = vrot.lane.b32.xlu0 %v3647_v41, %s4116_s29  ;;  %v3677_v41 = vpack.i.bf16 %v3863_v22, %v3862_v40 }
 0x556   : > { %3663 = vrot.lane.b32.xlu1 %v3662_v30, %s4116_s29  ;;  %v3866_v30 = vld [vmem:[%s4424_s13 + $0x58] sm:$0xff]  ;;  %s4117_s13 = smov [#allocation8]  }
 0x557   : > { %v3667_v53 = vpack.i.bf16 %v3866_v30, %v3865_v33 }
 0x573   : > { %1419 = vmax.xlane.f32.xlu0 %v5117_v9 }
 0x577   : > { %1425 = vmax.xlane.f32.xlu0 %v5123_v10 }
 0x57a   : > { %1421 = vmax.xlane.f32.xlu1 %v5129_v26 }
 0x57b   : > { %1423 = vmax.xlane.f32.xlu0 %v5135_v60 }
 0x57f   : > { %1429 = vmax.xlane.f32.xlu0 %v5141_v5 }
 0x583   : > { %1427 = vmax.xlane.f32.xlu0 %v5147_v23 }
 0x58b   : > { %3673 = vrot.lane.b32.xlu1 %v3672_v3, %s4116_s29  ;;  %v3873_v3 = vld [vmem:[%s4413_s1 + $0x38] sm:$0xff]  ;;  %s5593_s1 = sld [smem:[#allocation19_spill]] }
 0x58f   : > { %3678 = vrot.lane.b32.xlu1 %v3677_v41, %s4116_s29 }
 0x591   : > { %p5595_p3 = scmp.ne.s32.totalorder %s5593_s1, 0 }
 0x593   : > { %1648 = vrot.lane.b32.xlu1 %v3864_v7, %s4116_s29  ;;  %p3982_p2 = pnand %p3981_p10, %p5595_p3 }
 0x595   : > { %p3983_p11 = pneg %p3982_p2 }
 0x597   : > { %1652 = vrot.lane.b32.xlu1 %v3867_v15, %s4116_s29 }
 0x599   : > { %3668 = vrot.lane.b32.xlu0 %v3667_v53, %s4116_s29 }
 0x59b   : > { %1656 = vrot.lane.b32.xlu1 %v3868_v39, %s4116_s29 }
 0x59d   : > { %1650 = vrot.lane.b32.xlu0 %v3869_v14, %s4116_s29 }
 0x59f   : > { %1660 = vrot.lane.b32.xlu1 %v3870_v2, %s4116_s29 }
 0x5a1   : > { %1654 = vrot.lane.b32.xlu0 %v3871_v11, %s4116_s29 }
 0x5a5   : > { %1658 = vrot.lane.b32.xlu0 %v3872_v44, %s4116_s29 }
 0x5a9   : > { %1662 = vrot.lane.b32.xlu0 %v3873_v3, %s4116_s29 }
 0x5ca   : > { %v1418_v40 = vpop.xlane.xlu1 %1417 }
 0x5cb   : > { %v1432_v22 = vsub.f32 %v5093_v59, %v1418_v40  ;;  %v1416_v41 = vpop.xlane.xlu0 %1415 }
 0x5cc   : > { %v1431_v7 = vsub.f32 %v5099_v61, %v1416_v41 }
 0x5cd   : > { %v1441_v33 = vmul.f32 1.442695, %v1432_v22 }
 0x5ce   : > { %v1439_v30 = vmul.f32 1.442695, %v1431_v7  ;;  %v3654_v59 = vpop.permute.xlu1 %3653 }
 0x5cf   : > { %v3649_v53 = vpop.permute.xlu0 %3648  ;;  %v3656_v61 = vunpack.i.h.bf16 %v3654_v59  ;;  %v3655_v44 = vunpack.i.l.bf16 %v3654_v59 }
 0x5d0   : > { %3754 = vpow2.f32 %v1439_v30  ;;  %v3651_v15 = vunpack.i.h.bf16 %v3649_v53  ;;  %v3650_v39 = vunpack.i.l.bf16 %v3649_v53 }
 0x5d1   : > { %3756 = vpow2.f32 %v1441_v33  ;;  %v3293_v3 = vpack.c.bf16 %v3656_v61, %v3655_v44 }
 0x5d2   : > { %v3287_v11 = vpack.c.bf16 %v3651_v15, %v3650_v39  ;;  %v3659_v40 = vpop.permute.xlu1 %3658 }
 0x5d3   : > { %v3661_v22 = vunpack.i.h.bf16 %v3659_v40  ;;  %v3660_v41 = vunpack.i.l.bf16 %v3659_v40 }
 0x5d5   : > { %v3299_v7 = vpack.c.bf16 %v3661_v22, %v3660_v41 }
 0x5d6   : > { %v3664_v33 = vpop.permute.xlu1 %3663 }
 0x5d7   : > { %v3665_v30 = vunpack.i.l.bf16 %v3664_v33 }
 0x5da   : > { %v5177_v14 = vpop.eup %3754 }
 0x5db   : > { %v5179_v2 = vpop.eup %3756  ;;  %2941 = vmatprep.mubr.f32.mxu1 %v5177_v14 }
 0x5dc   : > { %2942 = vmatmul.mubr.f32.vlgmr.msra.gmra.mrb[16].mxu1 %v5179_v2 }
 0x5dd   : > { %3286 = vmatpush3.bf16.xpose.msk.msra.mxu1 %vm4432_vm1, %v5073_v48  ;;  %v3666_v48 = vunpack.i.h.bf16 %v3664_v33 }
 0x5de   : > { %3289 = vmatprep.subr.msk.bf16.mxu1 %vm4432_vm1, %v3287_v11 }
 0x5df   : > { %v3305_v53 = vpack.c.bf16 %v3666_v48, %v3665_v30 }
 0x5e5   : > { %3292 = vmatpush3.bf16.xpose.msk.msra.mxu1 %vm4432_vm1, %v3287_v11 }
 0x5e6   : > { %3295 = vmatprep.subr.msk.bf16.mxu1 %vm4432_vm1, %v3293_v3 }
 0x5ed   : > { %3298 = vmatpush3.bf16.xpose.msk.msra.mxu1 %vm4432_vm1, %v3293_v3 }
 0x5ee   : > { %3301 = vmatprep.subr.msk.bf16.mxu1 %vm4432_vm1, %v3299_v7 }
 0x5f5   : > { %3304 = vmatpush3.bf16.xpose.msk.msra.mxu1 %vm4432_vm1, %v3299_v7 }
 0x5f6   : > { %3307 = vmatprep.subr.msk.bf16.mxu1 %vm4432_vm1, %v3305_v53 }
 0x5fd   : > { %3310 = vmatpush3.bf16.xpose.msk.msra.mxu1 %vm4432_vm1, %v3305_v53 }
 0x600   : > { %v1420_v15 = vpop.xlane.xlu0 %1419 }
 0x601   : > { %v1433_v39 = vsub.f32 %v5117_v9, %v1420_v15 }
 0x603   : > { %v1443_v11 = vmul.f32 1.442695, %v1433_v39 }
 0x604   : > { %v1426_v59 = vpop.xlane.xlu0 %1425 }
 0x605   : > { %3758 = vpow2.f32 %v1443_v11  ;;  %v1436_v44 = vsub.f32 %v5123_v10, %v1426_v59 }
 0x607   : > { %v1422_v61 = vpop.xlane.xlu1 %1421  ;;  %v1449_v33 = vmul.f32 1.442695, %v1436_v44 }
 0x608   : > { %v1434_v3 = vsub.f32 %v5129_v26, %v1422_v61  ;;  %v1424_v40 = vpop.xlane.xlu0 %1423 }
 0x609   : > { %v1435_v22 = vsub.f32 %v5135_v60, %v1424_v40 }
 0x60a   : > { %v1445_v41 = vmul.f32 1.442695, %v1434_v3 }
 0x60b   : > { %v1447_v7 = vmul.f32 1.442695, %v1435_v22  ;;  %v3674_v10 = vpop.permute.xlu1 %3673 }
 0x60c   : > { %3760 = vpow2.f32 %v1445_v41  ;;  %v1430_v48 = vpop.xlane.xlu0 %1429  ;;  %v3676_v60 = vunpack.i.h.bf16 %v3674_v10  ;;  %v3675_v11 = vunpack.i.l.bf16 %v3674_v10 }
 0x60d   : > { %3762 = vpow2.f32 %v1447_v7  ;;  %v1438_v30 = vsub.f32 %v5141_v5, %v1430_v48 }
 0x60e   : > { %3764 = vpow2.f32 %v1449_v33  ;;  %v3317_v22 = vpack.c.bf16 %v3676_v60, %v3675_v11  ;;  %v3874_v60 = vld [vmem:[%s4565_s28] sm:$0xff]  ;;  %v3875_v11 = vld [vmem:[%s4565_s28 + $0x8] sm:$0xff] }
 0x60f   : > { %v5207_v9 = vpop.eup %3758  ;;  %v1453_v15 = vmul.f32 1.442695, %v1438_v30 }
 0x610   : > { %2944 = vmatprep.mubr.f32.mxu1 %v5207_v9  ;;  %v1428_v53 = vpop.xlane.xlu0 %1427 }
 0x611   : > { %v1437_v26 = vsub.f32 %v5147_v23, %v1428_v53  ;;  %v3679_v23 = vpop.permute.xlu1 %3678 }
 0x612   : > { %v3681_v7 = vunpack.i.h.bf16 %v3679_v23  ;;  %v3680_v33 = vunpack.i.l.bf16 %v3679_v23  ;;  %v3878_v23 = vld [vmem:[%s4565_s28 + $0x10] sm:$0xff] }
 0x613   : > { %v1451_v39 = vmul.f32 1.442695, %v1437_v26 }
 0x614   : > { %v3669_v59 = vpop.permute.xlu0 %3668  ;;  %v3323_v30 = vpack.c.bf16 %v3681_v7, %v3680_v33  ;;  %v3687_v7 = vpack.i.bf16 %v3879_v0, %v3878_v23 }
 0x615   : > { %3766 = vpow2.f32 %v1451_v39  ;;  %v3671_v61 = vunpack.i.h.bf16 %v3669_v59  ;;  %v3670_v44 = vunpack.i.l.bf16 %v3669_v59  ;;  %v1649_v53 = vpop.permute.xlu1 %1648  ;;  %v3682_v59 = vpack.i.bf16 %v3875_v11, %v3874_v60  ;;  %v3882_v11 = vld [vmem:[%s4565_s28 + $0x40] sm:$0xff] }
 0x616   : > { %v5211_v3 = vpop.eup %3760  ;;  %3768 = vpow2.f32 %v1453_v15 }
 0x617   : > { %v5213_v5 = vpop.eup %3762  ;;  %v3311_v40 = vpack.c.bf16 %v3671_v61, %v3670_v44  ;;  %2945 = vmatmul.mubr.f32.gmra.mrb[18].mxu1 %v5211_v3  ;;  %v3876_v61 = vld [vmem:[%s4565_s28 + $0x20] sm:$0xff]  ;;  %v3877_v44 = vld [vmem:[%s4565_s28 + $0x28] sm:$0xff]  ;;  %3683 = vrot.lane.b32.xlu1 %v3682_v59, %s4116_s29 }
 0x618   : > { %2947 = vmatprep.mubr.f32.mxu1 %v5213_v5  ;;  %v5219_v41 = vpop.eup %3764  ;;  %v1651_v26 = vpop.permute.xlu0 %1650  ;;  %v3883_v59 = vld [vmem:[%s4565_s28 + $0x48] sm:$0xff] }
 0x619   : > { %3313 = vmatprep.subr.msk.bf16.mxu1 %vm4432_vm1, %v3311_v40  ;;  %v1653_v15 = vpop.permute.xlu1 %1652 }
 0x61a   : > { %3316 = vmatpush3.bf16.xpose.msk.msra.mxu1 %vm4432_vm1, %v3311_v40  ;;  %v3692_v40 = vpack.i.bf16 %v3877_v44, %v3876_v61 }
 0x61b   : > { %2948 = vmatmul.mubr.f32.gmra.mrb[20].mxu1 %v5219_v41  ;;  %3319 = vmatprep.subr.msk.bf16.mxu1 %vm4432_vm1, %v3317_v22 }
 0x61c   : > { %v1655_v39 = vpop.permute.xlu0 %1654  ;;  %3693 = vrot.lane.b32.xlu0 %v3692_v40, %s4116_s29  ;;  %3688 = vrot.lane.b32.xlu1 %v3687_v7, %s4116_s29 }
 0x61f   : > { %v5226_v48 = vpop.eup %3766 }
 0x620   : > { %v5228_v10 = vpop.eup %3768  ;;  %2950 = vmatprep.mubr.f32.mxu1 %v5226_v48  ;;  %v1659_v33 = vpop.permute.xlu0 %1658 }
 0x621   : > { %2951 = vmatmul.mubr.f32.gmra.mrb[22].mxu1 %v5228_v10 }
 0x622   : > { %3322 = vmatpush3.bf16.xpose.msk.msra.mxu1 %vm4432_vm1, %v3317_v22  ;;  %2985 = vmatprep.mubr.msk.f32.mxu1 %vm353_vm0, %v1649_v53  ;;  %v1657_v22 = vpop.permute.xlu1 %1656  ;;  %v3881_v53 = vld [vmem:[%s4565_s28 + $0x38] sm:$0xff] }
 0x623   : > { %3325 = vmatprep.subr.msk.bf16.mxu1 %vm4432_vm1, %v3323_v30 }
 0x624   : > { %v1663_v60 = vpop.permute.xlu0 %1662 }
 0x62a   : > { %3328 = vmatpush3.bf16.xpose.msk.msra.mxu1 %vm4432_vm1, %v3323_v30  ;;  %v3880_v30 = vld [vmem:[%s4565_s28 + $0x30] sm:$0xff] }
 0x631   : > { %2986 = vmatmul.mubr.msk.f32.vlgmr.msra.gmra.mrb[24].mxu1 %vm353_vm0, %v1651_v26  ;;  %v3697_v26 = vpack.i.bf16 %v3881_v53, %v3880_v30 }
 0x632   : > { %2988 = vmatprep.mubr.msk.f32.mxu1 %vm353_vm0, %v1653_v15  ;;  %v1661_v15 = vpop.permute.xlu1 %1660 }
 0x633   : > { %3698 = vrot.lane.b32.xlu1 %v3697_v26, %s4116_s29 }
 0x635   : > { %2989 = vmatmul.mubr.msk.f32.gmra.mrb[26].mxu1 %vm353_vm0, %v1655_v39  ;;  %v3702_v39 = vpack.i.bf16 %v3883_v59, %v3882_v11 }
 0x636   : > { %2991 = vmatprep.mubr.msk.f32.mxu1 %vm353_vm0, %v1657_v22 }
 0x637   : > { %3703 = vrot.lane.b32.xlu0 %v3702_v39, %s4116_s29 }
 0x639   : > { %2992 = vmatmul.mubr.msk.f32.gmra.mrb[28].mxu1 %vm353_vm0, %v1659_v33 }
 0x63a   : > { %2994 = vmatprep.mubr.msk.f32.mxu1 %vm353_vm0, %v1661_v15 }
 0x63d   : > { %2995 = vmatmul.mubr.msk.f32.gmra.mrb[30].mxu1 %vm353_vm0, %v1663_v60 }
 0x689   : > { %v3684_v61 = vpop.permute.xlu1 %3683 }
 0x68a   : > { %v3686_v44 = vunpack.i.h.bf16 %v3684_v61  ;;  %v3685_v40 = vunpack.i.l.bf16 %v3684_v61 }
 0x68c   : > { %v3329_v22 = vpack.c.bf16 %v3686_v44, %v3685_v40 }
 0x68e   : > { %3330 = vmatprep.subr.bf16.mxu0 %v3329_v22  ;;  %v3689_v7 = vpop.permute.xlu1 %3688  ;;  %v3694_v26 = vpop.permute.xlu0 %3693 }
 0x68f   : > { %3332 = vmatpush3.bf16.msra.mxu0 %v3329_v22  ;;  %v3691_v33 = vunpack.i.h.bf16 %v3689_v7  ;;  %v3690_v30 = vunpack.i.l.bf16 %v3689_v7  ;;  %v3696_v15 = vunpack.i.h.bf16 %v3694_v26  ;;  %v3695_v60 = vunpack.i.l.bf16 %v3694_v26 }
 0x691   : > { %v3333_v53 = vpack.c.bf16 %v3691_v33, %v3690_v30  ;;  %v3337_v11 = vpack.c.bf16 %v3696_v15, %v3695_v60 }
 0x693   : > { %3334 = vmatprep.subr.bf16.mxu0 %v3333_v53 }
 0x694   : > { %3336 = vmatpush3.bf16.msra.mxu0 %v3333_v53 }
 0x695   : > { %3338 = vmatprep.subr.bf16.mxu0 %v3337_v11 }
 0x698   : > { %3340 = vmatpush3.bf16.msra.mxu0 %v3337_v11 }
 0x6a5   : > { %v3699_v59 = vpop.permute.xlu1 %3698 }
 0x6a6   : > { %v3701_v39 = vunpack.i.h.bf16 %v3699_v59  ;;  %v3700_v61 = vunpack.i.l.bf16 %v3699_v59 }
 0x6a8   : > { %v3341_v44 = vpack.c.bf16 %v3701_v39, %v3700_v61 }
 0x6a9   : > { %v3704_v40 = vpop.permute.xlu0 %3703 }
 0x6aa   : > { %3342 = vmatprep.subr.bf16.mxu0 %v3341_v44  ;;  %v3706_v22 = vunpack.i.h.bf16 %v3704_v40  ;;  %v3705_v42 = vunpack.i.l.bf16 %v3704_v40 }
 0x6ab   : > { %3344 = vmatpush3.bf16.msra.mxu0 %v3341_v44 }
 0x6ac   : > { %v3345_v4 = vpack.c.bf16 %v3706_v22, %v3705_v42 }
 0x6ae   : > { %3346 = vmatprep.subr.bf16.mxu0 %v3345_v4 }
 0x6af   : > { %v5261_v23 = vpop.f32.mrb[16].mxu1  ;;  %3348 = vmatpush3.bf16.msra.mxu0 %v3345_v4 }
 0x6b0   : > { %v5263_v0 = vpop.f32.mrb[17].mxu1 }
 0x6ea   : > { %v5265_v7 = vpop.f32.mrb[18].mxu1 }
 0x6eb   : > { %v5267_v33 = vpop.f32.mrb[19].mxu1 }
 0x6ee   : > { %v5269_v30 = vpop.f32.mrb[20].mxu1 }
 0x6ef   : > { %v5271_v53 = vpop.f32.mrb[21].mxu1 }
 0x6f4   : > { %v5273_v26 = vpop.f32.mrb[22].mxu1 }
 0x6f5   : > { %v5275_v15 = vpop.f32.mrb[23].mxu1 }
 0x704   : > { %v2987_v60 = vpop.f32.mrb[24].mxu1 }
 0x705   : > { %v1850_v11 = vmul.f32 0.17677669, %v2987_v60  ;;  %v1810_v59 = vpop.f32.mrb[25].mxu1 }
 0x706   : > { %v1849_v39 = vmul.f32 0.17677669, %v1810_v59 }
 0x707   : > { %v1858_v42 = vsel %vm346_vm3, %v1850_v11, -1e+30 }
 0x708   : > { %1867 = vmax.xlane.f32.xlu1 %v1858_v42  ;;  %v2990_v61 = vpop.f32.mrb[26].mxu1  ;;  %v1857_v4 = vsel %vm345_vm4, %v1849_v39, -1e+30 }
 0x709   : > { %v1852_v44 = vmul.f32 0.17677669, %v2990_v61  ;;  %1865 = vmax.xlane.f32.xlu0 %v1857_v4  ;;  %v1820_v40 = vpop.f32.mrb[27].mxu1 }
 0x70a   : > { %v1851_v22 = vmul.f32 0.17677669, %v1820_v40 }
 0x70b   : > { %v1860_v60 = vsel %vm348_vm8, %v1852_v44, -1e+30 }
 0x70c   : > { %1871 = vmax.xlane.f32.xlu1 %v1860_v60  ;;  %v2993_v59 = vpop.f32.mrb[28].mxu1  ;;  %v1859_v13 = vsel %vm347_vm5, %v1851_v22, -1e+30 }
 0x70d   : > { %v1854_v11 = vmul.f32 0.17677669, %v2993_v59  ;;  %1869 = vmax.xlane.f32.xlu0 %v1859_v13  ;;  %v1830_v19 = vpop.f32.mrb[29].mxu1 }
 0x70e   : > { %v1853_v39 = vmul.f32 0.17677669, %v1830_v19 }
 0x70f   : > { %v1862_v61 = vsel %vm350_vm6, %v1854_v11, -1e+30  ;;  %v3885_v11 = vld [vmem:[%s4565_s28 + $0x68] sm:$0xff] }
 0x710   : > { %v2996_v24 = vpop.f32.mrb[30].mxu1  ;;  %v1861_v44 = vsel %vm349_vm7, %v1853_v39, -1e+30  ;;  %v3712_v19 = vpack.i.bf16 %v3885_v11, %v3884_v6  ;;  %v3886_v39 = vld [vmem:[%s4565_s28 + $0x50] sm:$0xff] }
 0x711   : > { %v1856_v40 = vmul.f32 0.17677669, %v2996_v24  ;;  %1875 = vmax.xlane.f32.xlu0 %v1862_v61  ;;  %1873 = vmax.xlane.f32.xlu1 %v1861_v44  ;;  %v1840_v29 = vpop.f32.mrb[31].mxu1  ;;  %v3887_v24 = vld [vmem:[%s4565_s28 + $0x58] sm:$0xff] }
 0x712   : > { %v1855_v47 = vmul.f32 0.17677669, %v1840_v29  ;;  %v3707_v27 = vpack.i.bf16 %v3887_v24, %v3886_v39 }
 0x713   : > { %v5298_v22 = vsel %vm352_vm9, %v1856_v40, -1e+30  ;;  %v3889_v40 = vld [vmem:[%s4565_s28 + $0x78] sm:$0xff] }
 0x714   : > { %v5304_v59 = vsel %vm351_vm2, %v1855_v47, -1e+30  ;;  %v3717_v29 = vpack.i.bf16 %v3889_v40, %v3888_v25 }
 0x715   : > { %1879 = vmax.xlane.f32.xlu1 %v5298_v22 }
 0x719   : > { %1877 = vmax.xlane.f32.xlu1 %v5304_v59 }
 0x727   : > { %3713 = vrot.lane.b32.xlu0 %v3712_v19, %s4116_s29 }
 0x72a   : > { %3708 = vrot.lane.b32.xlu1 %v3707_v27, %s4116_s29 }
 0x72b   : > { %3718 = vrot.lane.b32.xlu0 %v3717_v29, %s4116_s29 }
 0x74a   : > { %989 = vadd.xlane.f32.xlu0 %v4981_v56 }
 0x74e   : > { %993 = vadd.xlane.f32.xlu0 %v5011_v62  ;;  %991 = vadd.xlane.f32.xlu1 %v4983_v57 }
 0x752   : > { %995 = vadd.xlane.f32.xlu0 %v5015_v31  ;;  %999 = vadd.xlane.f32.xlu1 %v5023_v36 }
 0x756   : > { %997 = vadd.xlane.f32.xlu0 %v5017_v20  ;;  %1003 = vadd.xlane.f32.xlu1 %v5032_v55 }
 0x75a   : > { %1001 = vadd.xlane.f32.xlu0 %v5030_v16  ;;  %1457 = vadd.xlane.f32.xlu1 %v5179_v2 }
 0x75e   : > { %1455 = vadd.xlane.f32.xlu0 %v5177_v14  ;;  %1461 = vadd.xlane.f32.xlu1 %v5211_v3 }
 0x762   : > { %1459 = vadd.xlane.f32.xlu0 %v5207_v9  ;;  %1465 = vadd.xlane.f32.xlu1 %v5219_v41 }
 0x766   : > { %1463 = vadd.xlane.f32.xlu0 %v5213_v5  ;;  %1469 = vadd.xlane.f32.xlu1 %v5228_v10 }
 0x76a   : > { %1467 = vadd.xlane.f32.xlu0 %v5226_v48  ;;  %589 = vadd.xlane.f32.xlu1 %v4770_v34 }
 0x76e   : > { %587 = vadd.xlane.f32.xlu0 %v4772_v32 }
 0x795   : > { %v1868_v50 = vpop.xlane.xlu1 %1867 }
 0x796   : > { %v1882_v51 = vsub.f32 %v1858_v42, %v1868_v50  ;;  %v1866_v27 = vpop.xlane.xlu0 %1865 }
 0x797   : > { %v1881_v56 = vsub.f32 %v1857_v4, %v1866_v27 }
 0x798   : > { %v1891_v57 = vmul.f32 1.442695, %v1882_v51 }
 0x799   : > { %v1889_v62 = vmul.f32 1.442695, %v1881_v56  ;;  %v1872_v31 = vpop.xlane.xlu1 %1871 }
 0x79a   : > { %3770 = vpow2.f32 %v1891_v57  ;;  %v1884_v20 = vsub.f32 %v1860_v60, %v1872_v31  ;;  %v1870_v36 = vpop.xlane.xlu0 %1869 }
 0x79b   : > { %3772 = vpow2.f32 %v1889_v62  ;;  %v1883_v16 = vsub.f32 %v1859_v13, %v1870_v36 }
 0x79c   : > { %v1895_v55 = vmul.f32 1.442695, %v1884_v20 }
 0x79d   : > { %v1893_v14 = vmul.f32 1.442695, %v1883_v16 }
 0x79e   : > { %3774 = vpow2.f32 %v1895_v55  ;;  %v1876_v2 = vpop.xlane.xlu0 %1875  ;;  %v1874_v9 = vpop.xlane.xlu1 %1873 }
 0x79f   : > { %3776 = vpow2.f32 %v1893_v14  ;;  %v1886_v34 = vsub.f32 %v1862_v61, %v1876_v2  ;;  %v1885_v32 = vsub.f32 %v1861_v44, %v1874_v9 }
 0x7a1   : > { %v1899_v3 = vmul.f32 1.442695, %v1886_v34  ;;  %v1897_v5 = vmul.f32 1.442695, %v1885_v32 }
 0x7a2   : > { %v1880_v41 = vpop.xlane.xlu1 %1879  ;;  %v3714_v42 = vpop.permute.xlu0 %3713 }
 0x7a3   : > { %3778 = vpow2.f32 %v1899_v3  ;;  %v1888_v48 = vsub.f32 %v5298_v22, %v1880_v41  ;;  %v3716_v11 = vunpack.i.h.bf16 %v3714_v42  ;;  %v3715_v19 = vunpack.i.l.bf16 %v3714_v42 }
 0x7a4   : > { %v3771_v10 = vpop.eup %3770  ;;  %3780 = vpow2.f32 %v1897_v5 }
 0x7a5   : > { %v3773_v4 = vpop.eup %3772  ;;  %v1903_v60 = vmul.f32 1.442695, %v1888_v48  ;;  %1907 = vadd.xlane.f32.xlu1 %v3771_v10  ;;  %v3353_v50 = vpack.c.bf16 %v3716_v11, %v3715_v19 }
 0x7a6   : > { %3029 = vmatprep.mubr.f32.mxu0 %v3773_v4  ;;  %1905 = vadd.xlane.f32.xlu0 %v3773_v4  ;;  %v1878_v13 = vpop.xlane.xlu1 %1877  ;;  %v3719_v39 = vpop.permute.xlu0 %3718 }
 0x7a7   : > { %3782 = vpow2.f32 %v1903_v60  ;;  %v1887_v47 = vsub.f32 %v5304_v59, %v1878_v13  ;;  %v3721_v51 = vunpack.i.h.bf16 %v3719_v39  ;;  %v3720_v27 = vunpack.i.l.bf16 %v3719_v39 }
 0x7a8   : > { %v3775_v61 = vpop.eup %3774 }
 0x7a9   : > { %v3777_v44 = vpop.eup %3776  ;;  %v1901_v6 = vmul.f32 1.442695, %v1887_v47  ;;  %1911 = vadd.xlane.f32.xlu1 %v3775_v61  ;;  %v3357_v57 = vpack.c.bf16 %v3721_v51, %v3720_v27 }
 0x7aa   : > { %1909 = vadd.xlane.f32.xlu0 %v3777_v44  ;;  %v3709_v22 = vpop.permute.xlu1 %3708 }
 0x7ab   : > { %3784 = vpow2.f32 %v1901_v6  ;;  %v3711_v24 = vunpack.i.h.bf16 %v3709_v22  ;;  %v3710_v25 = vunpack.i.l.bf16 %v3709_v22 }
 0x7ad   : > { %v3779_v40 = vpop.eup %3778  ;;  %v3349_v29 = vpack.c.bf16 %v3711_v24, %v3710_v25 }
 0x7ae   : > { %v3781_v56 = vpop.eup %3780  ;;  %1915 = vadd.xlane.f32.xlu1 %v3779_v40 }
 0x7af   : > { %1913 = vadd.xlane.f32.xlu0 %v3781_v56  ;;  %3350 = vmatprep.subr.bf16.mxu0 %v3349_v29 }
 0x7b0   : > { %3352 = vmatpush3.bf16.msra.mxu0 %v3349_v29 }
 0x7b1   : > { %v3783_v59 = vpop.eup %3782  ;;  %3354 = vmatprep.subr.bf16.mxu0 %v3353_v50 }
 0x7b2   : > { %1919 = vadd.xlane.f32.xlu1 %v3783_v59 }
 0x7b4   : > { %3356 = vmatpush3.bf16.msra.mxu0 %v3353_v50 }
 0x7b5   : > { %v3785_v62 = vpop.eup %3784  ;;  %3358 = vmatprep.subr.bf16.mxu0 %v3357_v57 }
 0x7b6   : > { %593 = vadd.xlane.f32.xlu1 %v4805_v28  ;;  %1917 = vadd.xlane.f32.xlu0 %v3785_v62 }
 0x7b8   : > { %3360 = vmatpush3.bf16.msra.mxu0 %v3357_v57 }
 0x7ba   : > { %597 = vadd.xlane.f32.xlu1 %v4814_v49  ;;  %591 = vadd.xlane.f32.xlu0 %v4774_v35 }
 0x7bb   : > { %3030 = vmatmul.mubr.f32.vlgmr.msra.gmra.mrb[24].mxu0 %v3771_v10 }
 0x7bc   : > { %3032 = vmatprep.mubr.f32.mxu0 %v3777_v44 }
 0x7be   : > { %601 = vadd.xlane.f32.xlu1 %v4826_v43  ;;  %595 = vadd.xlane.f32.xlu0 %v4810_v17 }
 0x7bf   : > { %3033 = vmatmul.mubr.f32.gmra.mrb[26].mxu0 %v3775_v61 }
 0x7c0   : > { %3035 = vmatprep.mubr.f32.mxu0 %v3781_v56 }
 0x7c2   : > { %599 = vadd.xlane.f32.xlu0 %v4824_v21 }
 0x7c3   : > { %3036 = vmatmul.mubr.f32.gmra.mrb[28].mxu0 %v3779_v40 }
 0x7c4   : > { %3038 = vmatprep.mubr.f32.mxu0 %v3785_v62 }
 0x7c7   : > { %3039 = vmatmul.mubr.f32.gmra.mrb[30].mxu0 %v3783_v59 }
 0x7d7   : > { %v990_v28 = vpop.xlane.xlu0 %989 }
 0x7d8   : > { %3786 = vrcp.f32 %v990_v28 }
 0x7db   : > { %v994_v31 = vpop.xlane.xlu0 %993  ;;  %v992_v20 = vpop.xlane.xlu1 %991 }
 0x7dc   : > { %3788 = vrcp.f32 %v992_v20 }
 0x7dd   : > { %3790 = vrcp.f32 %v994_v31 }
 0x7df   : > { %v996_v35 = vpop.xlane.xlu0 %995  ;;  %v1000_v49 = vpop.xlane.xlu1 %999 }
 0x7e0   : > { %3792 = vrcp.f32 %v996_v35 }
 0x7e1   : > { %3794 = vrcp.f32 %v1000_v49 }
 0x7e2   : > { %v3787_v36 = vpop.eup %3786 }
 0x7e3   : > { %v998_v43 = vpop.xlane.xlu0 %997  ;;  %v1004_v17 = vpop.xlane.xlu1 %1003  ;;  %v1190_v16 = vmul.f32 %v3787_v36, %v5071_v38 }
 0x7e4   : > { %3796 = vrcp.f32 %v998_v43 }
 0x7e5   : > { %2106 = vrot.lane.b32.xlu0 %v1190_v16, %s4116_s29  ;;  %3798 = vrcp.f32 %v1004_v17 }
 0x7e6   : > { %v3789_v21 = vpop.eup %3788 }
 0x7e7   : > { %v1002_v55 = vpop.xlane.xlu0 %1001  ;;  %v1458_v14 = vpop.xlane.xlu1 %1457  ;;  %v1191_v2 = vmul.f32 %v3789_v21, %v5069_v37 }
 0x7e8   : > { %3800 = vrcp.f32 %v1002_v55  ;;  %v3791_v9 = vpop.eup %3790 }
 0x7e9   : > { %3802 = vrcp.f32 %v1458_v14  ;;  %2108 = vrot.lane.b32.xlu1 %v1191_v2, %s4116_s29  ;;  %v1192_v41 = vmul.f32 %v3791_v9, %v5080_v12 }
 0x7ea   : > { %v3793_v34 = vpop.eup %3792 }
 0x7eb   : > { %v1456_v32 = vpop.xlane.xlu0 %1455  ;;  %v1462_v3 = vpop.xlane.xlu1 %1461  ;;  %v1193_v5 = vmul.f32 %v3793_v34, %v5078_v18 }
 0x7ec   : > { %v3795_v38 = vpop.eup %3794  ;;  %3804 = vrcp.f32 %v1456_v32 }
 0x7ed   : > { %2112 = vrot.lane.b32.xlu0 %v1193_v5, %s4116_s29  ;;  %3806 = vrcp.f32 %v1462_v3  ;;  %2110 = vrot.lane.b32.xlu1 %v1192_v41, %s4116_s29  ;;  %v1195_v4 = vmul.f32 %v3795_v38, %v5082_v45 }
 0x7ee   : > { %v3797_v48 = vpop.eup %3796 }
 0x7ef   : > { %v1460_v37 = vpop.xlane.xlu0 %1459  ;;  %v1466_v10 = vpop.xlane.xlu1 %1465  ;;  %v1194_v42 = vmul.f32 %v3797_v48, %v5084_v63 }
 0x7f0   : > { %v3799_v60 = vpop.eup %3798  ;;  %3808 = vrcp.f32 %v1460_v37 }
 0x7f1   : > { %2116 = vrot.lane.b32.xlu0 %v1195_v4, %s4116_s29  ;;  %3810 = vrcp.f32 %v1466_v10  ;;  %2114 = vrot.lane.b32.xlu1 %v1194_v42, %s4116_s29  ;;  %v1197_v61 = vmul.f32 %v3799_v60, %v5086_v58 }
 0x7f2   : > { %v3801_v18 = vpop.eup %3800 }
 0x7f3   : > { %v1464_v12 = vpop.xlane.xlu0 %1463  ;;  %v1470_v13 = vpop.xlane.xlu1 %1469  ;;  %v1196_v47 = vmul.f32 %v3801_v18, %v5088_v1 }
 0x7f4   : > { %v3803_v44 = vpop.eup %3802  ;;  %3812 = vrcp.f32 %v1464_v12 }
 0x7f5   : > { %2120 = vrot.lane.b32.xlu0 %v1197_v61, %s4116_s29  ;;  %3814 = vrcp.f32 %v1470_v13  ;;  %2118 = vrot.lane.b32.xlu1 %v1196_v47, %s4116_s29  ;;  %v1641_v19 = vmul.f32 %v3803_v44, %v5261_v23 }
 0x7f6   : > { %v3805_v63 = vpop.eup %3804 }
 0x7f7   : > { %v1468_v45 = vpop.xlane.xlu0 %1467  ;;  %v590_v6 = vpop.xlane.xlu1 %589  ;;  %v1640_v11 = vmul.f32 %v3805_v63, %v5263_v0 }
 0x7f8   : > { %v3807_v22 = vpop.eup %3806  ;;  %3816 = vrcp.f32 %v1468_v45 }
 0x7f9   : > { %3818 = vrcp.f32 %v590_v6  ;;  %2140 = vrot.lane.b32.xlu0 %v1641_v19, %s4115_s3  ;;  %2138 = vrot.lane.b32.xlu1 %v1640_v11, %s4115_s3  ;;  %v1643_v24 = vmul.f32 %v3807_v22, %v5265_v7 }
 0x7fa   : > { %v3809_v58 = vpop.eup %3808 }
 0x7fb   : > { %v588_v1 = vpop.xlane.xlu0 %587  ;;  %v1642_v39 = vmul.f32 %v3809_v58, %v5267_v33  ;;  %v3811_v25 = vpop.eup %3810 }
 0x7fc   : > { %3820 = vrcp.f32 %v588_v1  ;;  %v1645_v40 = vmul.f32 %v3811_v25, %v5269_v30 }
 0x7fd   : > { %2144 = vrot.lane.b32.xlu0 %v1643_v24, %s4115_s3  ;;  %2142 = vrot.lane.b32.xlu1 %v1642_v39, %s4115_s3 }
 0x7fe   : > { %v3813_v0 = vpop.eup %3812 }
 0x7ff   : > { %v1644_v23 = vmul.f32 %v3813_v0, %v5271_v53  ;;  %v3815_v29 = vpop.eup %3814 }
 0x800   : > { %v1647_v51 = vmul.f32 %v3815_v29, %v5273_v26 }
 0x801   : > { %2148 = vrot.lane.b32.xlu0 %v1645_v40, %s4115_s3  ;;  %2146 = vrot.lane.b32.xlu1 %v1644_v23, %s4115_s3 }
 0x802   : > { %v3817_v50 = vpop.eup %3816 }
 0x803   : > { %v3819_v33 = vpop.eup %3818  ;;  %v1646_v7 = vmul.f32 %v3817_v50, %v5275_v15 }
 0x804   : > { %v5373_v27 = vmul.f32 %v3819_v33, %v4888_v46 }
 0x805   : > { %2152 = vrot.lane.b32.xlu0 %v1647_v51, %s4115_s3  ;;  %2150 = vrot.lane.b32.xlu1 %v1646_v7, %s4115_s3 }
 0x806   : > { %v3821_v56 = vpop.eup %3820 }
 0x807   : > { %v5378_v30 = vmul.f32 %v3821_v56, %v4890_v52 }
 0x832   : > { %v1908_v53 = vpop.xlane.xlu1 %1907 }
 0x833   : > { %v1906_v59 = vpop.xlane.xlu0 %1905  ;;  %3822 = vrcp.f32 %v1908_v53 }
 0x834   : > { %3824 = vrcp.f32 %v1906_v59 }
 0x836   : > { %v1912_v57 = vpop.xlane.xlu1 %1911 }
 0x837   : > { %v1910_v62 = vpop.xlane.xlu0 %1909  ;;  %3826 = vrcp.f32 %v1912_v57 }
 0x838   : > { %3828 = vrcp.f32 %v1910_v62 }
 0x83b   : > { %v1916_v15 = vpop.xlane.xlu1 %1915 }
 0x83c   : > { %v1914_v26 = vpop.xlane.xlu0 %1913  ;;  %3830 = vrcp.f32 %v1916_v15 }
 0x83d   : > { %3832 = vrcp.f32 %v1914_v26  ;;  %v3823_v28 = vpop.eup %3822 }
 0x83e   : > { %v3825_v35 = vpop.eup %3824 }
 0x83f   : > { %v1920_v46 = vpop.xlane.xlu1 %1919 }
 0x840   : > { %3834 = vrcp.f32 %v1920_v46 }
 0x841   : > { %v3827_v43 = vpop.eup %3826 }
 0x842   : > { %v3829_v16 = vpop.eup %3828 }
 0x843   : > { %v1918_v31 = vpop.xlane.xlu0 %1917  ;;  %v594_v4 = vpop.xlane.xlu1 %593 }
 0x844   : > { %3836 = vrcp.f32 %v1918_v31  ;;  %v5589_v31 = vld [vmem:[#allocation25_spill] sm:$0xff] }
 0x845   : > { %3838 = vrcp.f32 %v594_v4 }
 0x846   : > { %v3831_v2 = vpop.eup %3830 }
 0x847   : > { %v3833_v34 = vpop.eup %3832  ;;  %v592_v60 = vpop.xlane.xlu0 %591 }
 0x848   : > { %v598_v18 = vpop.xlane.xlu1 %597  ;;  %3840 = vrcp.f32 %v592_v60 }
 0x849   : > { %3842 = vrcp.f32 %v598_v18 }
 0x84a   : > { %v3835_v38 = vpop.eup %3834 }
 0x84b   : > { %v596_v12 = vpop.xlane.xlu0 %595 }
 0x84c   : > { %v602_v13 = vpop.xlane.xlu1 %601  ;;  %3844 = vrcp.f32 %v596_v12 }
 0x84d   : > { %3846 = vrcp.f32 %v602_v13 }
 0x84e   : > { %v3837_v48 = vpop.eup %3836 }
 0x84f   : > { %v600_v47 = vpop.xlane.xlu0 %599  ;;  %v3839_v29 = vpop.eup %3838 }
 0x850   : > { %3848 = vrcp.f32 %v600_v47  ;;  %v727_v53 = vmul.f32 %v3839_v29, %v4897_v8 }
 0x852   : > { %v3841_v50 = vpop.eup %3840 }
 0x853   : > { %v3843_v15 = vpop.eup %3842  ;;  %v726_v26 = vmul.f32 %v3841_v50, %v4899_v54 }
 0x857   : > { %v2107_v44 = vpop.permute.xlu0 %2106 }
 0x858   : > { %v2194_v7 = vsel %vm353_vm0, %v5378_v30, %v2107_v44  ;;  %v3845_v30 = vpop.eup %3844 }
 0x85b   : > { %v2109_v61 = vpop.permute.xlu1 %2108 }
 0x85c   : > { %v2195_v33 = vsel %vm353_vm0, %v5373_v27, %v2109_v61 }
 0x85f   : > { %v2113_v63 = vpop.permute.xlu0 %2112  ;;  %v2111_v45 = vpop.permute.xlu1 %2110 }
 0x860   : > { %v2197_v8 = vsel %vm353_vm0, %v727_v53, %v2113_v63  ;;  %v2196_v46 = vsel %vm353_vm0, %v726_v26, %v2111_v45 }
 0x863   : > { %v2117_v6 = vpop.permute.xlu0 %2116  ;;  %v2115_v11 = vpop.permute.xlu1 %2114 }
 0x867   : > { %v5388_v19 = vpop.permute.xlu0 %2120  ;;  %v5390_v22 = vpop.permute.xlu1 %2118 }
 0x86b   : > { %v2141_v58 = vpop.permute.xlu0 %2140  ;;  %v2139_v1 = vpop.permute.xlu1 %2138 }
 0x86c   : > { %v2204_v51 = vsel %vm2202_vm10, %v2195_v33, %v2141_v58  ;;  %v2203_v59 = vsel %vm2202_vm10, %v2194_v7, %v2139_v1 }
 0x86f   : > { %v2145_v39 = vpop.permute.xlu0 %2144  ;;  %v2143_v24 = vpop.permute.xlu1 %2142 }
 0x870   : > { %v2206_v54 = vsel %vm2202_vm10, %v2197_v8, %v2145_v39 }
 0x873   : > { %v2149_v25 = vpop.permute.xlu0 %2148  ;;  %v2147_v0 = vpop.permute.xlu1 %2146 }
 0x877   : > { %v2153_v23 = vpop.permute.xlu0 %2152  ;;  %v2151_v40 = vpop.permute.xlu1 %2150 }
 0x88e   : > { %v3031_v20 = vpop.f32.mrb[24].mxu0 }
 0x88f   : > { %v2091_v49 = vmul.f32 %v3823_v28, %v3031_v20  ;;  %v2035_v52 = vpop.f32.mrb[25].mxu0  ;;  %v729_v20 = vmul.f32 %v3843_v15, %v5589_v31 }
 0x890   : > { %v2090_v36 = vmul.f32 %v3825_v35, %v2035_v52  ;;  %v2205_v35 = vsel %vm2202_vm10, %v2196_v46, %v2143_v24 }
 0x891   : > { %2172 = vrot.lane.b32.xlu0 %v2091_v49, %s4114_s23 }
 0x892   : > { %2170 = vrot.lane.b32.xlu1 %v2090_v36, %s4114_s23  ;;  %v3034_v17 = vpop.f32.mrb[26].mxu0  ;;  %v3847_v36 = vpop.eup %3846 }
 0x893   : > { %v2093_v21 = vmul.f32 %v3827_v43, %v3034_v17  ;;  %v2045_v55 = vpop.f32.mrb[27].mxu0  ;;  %v5590_v43 = vld [vmem:[#allocation26_spill] sm:$0xff] }
 0x894   : > { %v2092_v14 = vmul.f32 %v3829_v16, %v2045_v55  ;;  %v728_v17 = vmul.f32 %v3845_v30, %v5590_v43  ;;  %v2199_v55 = vsel %vm353_vm0, %v729_v20, %v2117_v6 }
 0x895   : > { %2176 = vrot.lane.b32.xlu0 %v2093_v21, %s4114_s23  ;;  %v3849_v21 = vpop.eup %3848 }
 0x896   : > { %2174 = vrot.lane.b32.xlu1 %v2092_v14, %s4114_s23  ;;  %v3037_v9 = vpop.f32.mrb[28].mxu0  ;;  %v2198_v14 = vsel %vm353_vm0, %v728_v17, %v2115_v11 }
 0x897   : > { %v2095_v32 = vmul.f32 %v3831_v2, %v3037_v9  ;;  %v2055_v3 = vpop.f32.mrb[29].mxu0  ;;  %v2208_v2 = vsel %vm2202_vm10, %v2199_v55, %v2149_v25 }
 0x898   : > { %v2094_v5 = vmul.f32 %v3833_v34, %v2055_v3  ;;  %v5591_v34 = vld [vmem:[#allocation27_spill] sm:$0xff]  ;;  %v2207_v3 = vsel %vm2202_vm10, %v2198_v14, %v2147_v0 }
 0x899   : > { %2180 = vrot.lane.b32.xlu0 %v2095_v32, %s4114_s23  ;;  %v731_v32 = vmul.f32 %v3847_v36, %v5591_v34 }
 0x89a   : > { %2178 = vrot.lane.b32.xlu1 %v2094_v5, %s4114_s23  ;;  %v3040_v41 = vpop.f32.mrb[30].mxu0 }
 0x89b   : > { %v2097_v37 = vmul.f32 %v3835_v38, %v3040_v41  ;;  %v2065_v10 = vpop.f32.mrb[31].mxu0  ;;  %v5592_v41 = vld [vmem:[#allocation28_spill] sm:$0xff] }
 0x89c   : > { %v2096_v42 = vmul.f32 %v3837_v48, %v2065_v10  ;;  %v730_v48 = vmul.f32 %v3849_v21, %v5592_v41  ;;  %v2201_v10 = vsel %vm353_vm0, %v731_v32, %v5388_v19 }
 0x89d   : > { %2184 = vrot.lane.b32.xlu0 %v2097_v37, %s4114_s23  ;;  %v2210_v4 = vsel %vm2202_vm10, %v2201_v10, %v2153_v23 }
 0x89e   : > { %2182 = vrot.lane.b32.xlu1 %v2096_v42, %s4114_s23  ;;  %v2200_v42 = vsel %vm353_vm0, %v730_v48, %v5390_v22  ;;  %s3984_s23 = sshll.u32 %s4117_s13, 4  ;;  %s3985_s23 = int_to_ptr.vmem [resolvable:$false] %s3984_s23 }
 0x89f   : > { %v2209_v18 = vsel %vm2202_vm10, %v2200_v42, %v2151_v40  ;;  %s3986_s7 = scalar_lea.vmem %s3985_s23, 2048  ;;  %p3987_p1 = scmp.lt.s32.totalorder %s5432_s19, %s3985_s23 }
 0x8a0   : > { %p3988_p13 = scmp.lt.s32.totalorder %s3986_s7, %s3980_s18 }
 0x8a2   : > { %p3989_p0 = por %p3988_p13, %p3987_p1 }
 0x8a4   : > { %p3990_p6 = pnand %p3989_p0, %p3983_p11 }
 0x903   : > { %v2173_v56 = vpop.permute.xlu0 %2172 }
 0x904   : > { %v2213_v57 = vsel %vm2211_vm11, %v2204_v51, %v2173_v56  ;;  %v2171_v62 = vpop.permute.xlu1 %2170 }
 0x905   : > { %2221 = vst [vmem:[%s5403_s12 + $0x8] sm:$0xff] %v2213_v57  ;;  %v2212_v27 = vsel %vm2211_vm11, %v2203_v59, %v2171_v62 }
 0x906   : > { %2220 = vst [vmem:[%s5403_s12] sm:$0xff] %v2212_v27 }
 0x907   : > { %v2177_v28 = vpop.permute.xlu0 %2176 }
 0x908   : > { %v2215_v49 = vsel %vm2211_vm11, %v2206_v54, %v2177_v28  ;;  %v2175_v52 = vpop.permute.xlu1 %2174 }
 0x909   : > { %2223 = vst [vmem:[%s5403_s12 + $0x18] sm:$0xff] %v2215_v49  ;;  %v2214_v16 = vsel %vm2211_vm11, %v2205_v35, %v2175_v52 }
 0x90a   : > { %2222 = vst [vmem:[%s5403_s12 + $0x10] sm:$0xff] %v2214_v16 }
 0x90b   : > { %v2181_v9 = vpop.permute.xlu0 %2180 }
 0x90c   : > { %v2217_v5 = vsel %vm2211_vm11, %v2208_v2, %v2181_v9  ;;  %v2179_v38 = vpop.permute.xlu1 %2178 }
 0x90d   : > { %2225 = vst [vmem:[%s5403_s12 + $0x28] sm:$0xff] %v2217_v5  ;;  %v2216_v37 = vsel %vm2211_vm11, %v2207_v3, %v2179_v38 }
 0x90e   : > { %2224 = vst [vmem:[%s5403_s12 + $0x20] sm:$0xff] %v2216_v37 }
 0x90f   : > { %v2185_v60 = vpop.permute.xlu0 %2184 }
 0x910   : > { %v2219_v12 = vsel %vm2211_vm11, %v2210_v4, %v2185_v60  ;;  %v2183_v13 = vpop.permute.xlu1 %2182 }
 0x911   : > { %2227 = vst [vmem:[%s5403_s12 + $0x38] sm:$0xff] %v2219_v12  ;;  %v2218_v47 = vsel %vm2211_vm11, %v2209_v18, %v2183_v13 }
 0x912   : > { %2226 = vst [vmem:[%s5403_s12 + $0x30] sm:$0xff] %v2218_v47 }
 0x913   : > { %3993 = shalt.err (!%p3990_p6)
}
 0x914   : > { %s3994_s28 = scalar_lea.hbm %s5441_s10, 1024  ;;  %s3998_s29 = scalar_lea.hbm %s5594_s24, 4096 }
 0x915   : > { %p3995_p5 = scmp.ne.s32.totalorder %s5441_s10, %s3994_s28  ;;  %p3999_p9 = scmp.lt.u32.totalorder %s5441_s10, %s5594_s24 }
 0x916   : > { %p4000_p12 = scmp.lt.u32.totalorder %s3998_s29, %s3994_s28  ;;  %p4002_p10 = scmp.lt.u32.totalorder %s3994_s28, %s5441_s10 }
 0x917   : > { %p3996_p8 = pnand %p3995_p5, %p5595_p3 }
 0x918   : > { %p4001_p4 = por %p4000_p12, %p3999_p9 }
 0x919   : > { %p3997_p7 = pneg %p3996_p8 }
 0x91a   : > { %p4003_p2 = por %p4002_p10, %p4001_p4 }
 0x91c   : > { %p4004_p11 = pnand %p4003_p2, %p3997_p7 }
 0x91e   : > { %4007 = shalt.err (!%p4004_p11)
}
 0x91f   : > { %s4118_s11 = smov 128   ;;  %s4119_s4 = smov 256  }
 0x920   : > { %s4120_s8 = smov 8  }
 0x921   : > { %3367 = dma.vmem_to_hbm [thread:$0]  (%p5595_p3), %s5432_s19, 1024, %s5441_s10, %s2229_s15, %s4118_s11, %s4119_s4, %s4120_s8  }
 0x922 PF: > { %s5596_s25 = sld [smem:[#allocation13_spill]]  ;;  %s5597_s6 = sld [smem:[#allocation20_spill]] }
 0x923   : > { %p3384_p1 = scmp.ge.s32.totalorder %s4106_s22, 2 }
 0x928   : > { %s2259_s18 = sand.u32 1, %s5596_s25   ;;  %p5598_p13 = scmp.ne.s32.totalorder %s5597_s6, 0 }
 0x929   : > { %s2260_s13 = scalar_lea.sflag [#allocation4], %s2259_s18 }
 0x92a   : > { %p3380_p0 = pnand %p3384_p1, %p5598_p13 }
 0x92c   : > { %4061 = dma.done.wait (!%p3380_p0), %s2260_s13, 1024  }
 0x92d   : > { %4063 = vsyncadd (!%p3380_p0), %s2260_s13, 4294966272  ;;  %s22_s22 = sadd.s32 1, %s4106_s22   ;;  %s5599_s12 = sld [smem:[#allocation12_spill]] }
 0x92e   : > { %p19_p6 = scmp.ge.s32.totalorder %s22_s22, 6   ;;  %s5600_s5 = sld [smem:[#allocation17_spill]] }
 0x92f   : > { %s5601_s1 = sld [smem:[#allocation18_spill]]  ;;  %s5602_s13 = smov %s4074_s14 }
 0x930   : > { %s5603_s14 = smov %s4320_s26  ;;  %s5604_s15 = smov %s4082_s16 }
 0x931   : > { %s5605_s16 = smov %s4086_s17  ;;  %s5606_s17 = smov %s4323_s30 }
 0x932   : > { %s5607_s18 = smov %s4098_s20  ;;  %s5608_s19 = smov %s4102_s21 }
 0x933   :  { %21 = sbr.rel (!%p19_p6) target bundleno = 14 (0xe), region = 101 }
 0x934   : > { %s5609_s20 = smov %s5600_s5 }
 0x935   : > { %s5610_s21 = smov %s5601_s1 }
 0x93a   :  { %2265 = vsyncpa [#allocation3], 1 }
 0x93b   :  { %2267 = vsyncpa [#allocation3 + $0x1], 1 }
 0x93c   :  { %2268 = vsyncpa [#allocation6], 1 }
 0x93d   :  { %2270 = vsyncpa [#allocation6 + $0x1], 1 }
 0x93e   :  { %2271 = vsyncpa [#allocation4], 1 }
 0x93f   :  { %2273 = vsyncpa [#allocation4 + $0x1], 1 }

</bundles_post_ra>
